<compile_context>
chip_gen: v5e
topology: v5e:2x2
jax: 0.10.0
libtpu: 0.0.40
codegen_flags: <defaults>
</compile_context>

<pallas_src>
import functools

import jax
import jax.numpy as jnp
import numpy as np
from jax.experimental import pallas as pl
from jax.experimental.pallas import tpu as pltpu


def _round_up(n, m):
    return (n + m - 1) // m * m


def _pad2(a, rows, cols):
    r, c = a.shape
    return jnp.pad(a, ((0, rows - r), (0, cols - c)))


# ----------------------------------------------------------------------------
# Fused VAE forward kernel: one batch tile, all layers in VMEM.
#   matmuls: bf16 operands, f32 accumulation.  elementwise: f32.
# ----------------------------------------------------------------------------
def _vae_kernel(x_ref, eps_ref,
                w1_ref, b1_ref, w2_ref, b2_ref,
                w3_ref, b3_ref, w4_ref, b4_ref,
                recon_ref, mu_ref, logvar_ref, *, lp):
    x = x_ref[...].astype(jnp.bfloat16)

    # encode: h1 = relu(fc1(x))
    h1 = jnp.maximum(
        jnp.dot(x, w1_ref[...], preferred_element_type=jnp.float32) + b1_ref[...],
        0.0)

    # fused fc21|fc22: one (Hp, 2*Lp) projection, then split mu / logvar.
    ml = jnp.dot(h1.astype(jnp.bfloat16), w2_ref[...],
                 preferred_element_type=jnp.float32) + b2_ref[...]
    mu = ml[:, :lp]
    logvar = ml[:, lp:]

    # reparameterize: z = mu + eps * exp(0.5 * logvar)   (f32)
    z = mu + eps_ref[...] * jnp.exp(0.5 * logvar)

    # decode: sigmoid(fc4(relu(fc3(z))))
    h3 = jnp.maximum(
        jnp.dot(z.astype(jnp.bfloat16), w3_ref[...],
                preferred_element_type=jnp.float32) + b3_ref[...],
        0.0)
    logits = jnp.dot(h3.astype(jnp.bfloat16), w4_ref[...],
                     preferred_element_type=jnp.float32) + b4_ref[...]

    recon_ref[...] = jax.nn.sigmoid(logits)
    mu_ref[...] = mu
    logvar_ref[...] = logvar


def vae_forward(params, x, eps, *, batch_tile=256):
    """Mirrors linear_VAE.forward: x.view(-1, input_size) -> (recon, mu, logvar).

    params hold (in, out)-layout f32 weights and 1-D biases (unpadded).
    eps: (B, 20) standard-normal noise (replaces torch.randn_like).
    """
    assert batch_tile > 0 and batch_tile % 8 == 0, \
        "batch_tile must be a positive multiple of the f32 sublane count (8)"

    D = params["w1"].shape[0]          # input_size
    Hd = params["w1"].shape[1]         # 400
    L = params["w21"].shape[1]         # 20

    x2 = x.reshape(-1, D).astype(jnp.float32)
    B = x2.shape[0]

    Dp = _round_up(D, 128)
    Hp = _round_up(Hd, 128)
    Lp = _round_up(L, 128)

    # Weights: zero-pad to lane multiples, cast to bf16 MXU operands.
    # Biases stay f32 (added post-accumulation on the VPU).
    w1 = _pad2(params["w1"], Dp, Hp).astype(jnp.bfloat16)
    b1 = _pad2(params["b1"][None, :], 1, Hp)
    w2 = jnp.concatenate(                     # fused fc21 | fc22
        [_pad2(params["w21"], Hp, Lp), _pad2(params["w22"], Hp, Lp)],
        axis=1).astype(jnp.bfloat16)
    b2 = jnp.concatenate(
        [_pad2(params["b21"][None, :], 1, Lp), _pad2(params["b22"][None, :], 1, Lp)],
        axis=1)
    w3 = _pad2(params["w3"], Lp, Hp).astype(jnp.bfloat16)
    b3 = _pad2(params["b3"][None, :], 1, Hp)
    w4 = _pad2(params["w4"], Hp, Dp).astype(jnp.bfloat16)
    b4 = _pad2(params["b4"][None, :], 1, Dp)

    kernel = functools.partial(_vae_kernel, lp=Lp)

    if B <= batch_tile:
        # -------- Tiny batch: single gridless block (no pipeline bookkeeping).
        Bp = _round_up(max(B, 8), 8)
        xp = _pad2(x2, Bp, Dp)
        epsp = _pad2(eps.astype(jnp.float32), Bp, Lp)
        recon_p, mu_p, logvar_p = pl.pallas_call(
            kernel,
            out_shape=(
                jax.ShapeDtypeStruct((Bp, Dp), jnp.float32),
                jax.ShapeDtypeStruct((Bp, Lp), jnp.float32),
                jax.ShapeDtypeStruct((Bp, Lp), jnp.float32),
            ),
        )(xp, epsp, w1, b1, w2, b2, w3, b3, w4, b4)
    else:
        # -------- Large batch: tile over batch; grid >= 2 (B > TB), so the
        # "parallel" axis can be sharded across v7x's two TensorCores.
        TB = batch_tile
        Bp = _round_up(B, TB)
        xp = _pad2(x2, Bp, Dp)
        epsp = _pad2(eps.astype(jnp.float32), Bp, Lp)

        def build(single_buffer_weights):
            if single_buffer_weights:
                def wspec(shape):
                    return pl.BlockSpec(shape, lambda i: (0, 0),
                                        pipeline_mode=pl.Buffered(1))
            else:
                def wspec(shape):
                    return pl.BlockSpec(shape, lambda i: (0, 0))
            return pl.pallas_call(
                kernel,
                out_shape=(
                    jax.ShapeDtypeStruct((Bp, Dp), jnp.float32),
                    jax.ShapeDtypeStruct((Bp, Lp), jnp.float32),
                    jax.ShapeDtypeStruct((Bp, Lp), jnp.float32),
                ),
                grid=(Bp // TB,),
                in_specs=[
                    pl.BlockSpec((TB, Dp), lambda i: (i, 0)),     # x tile
                    pl.BlockSpec((TB, Lp), lambda i: (i, 0)),     # eps tile
                    wspec((Dp, Hp)), wspec((1, Hp)),              # fc1
                    wspec((Hp, 2 * Lp)), wspec((1, 2 * Lp)),      # fc21|fc22 fused
                    wspec((Lp, Hp)), wspec((1, Hp)),              # fc3
                    wspec((Hp, Dp)), wspec((1, Dp)),              # fc4
                ],
                out_specs=(
                    pl.BlockSpec((TB, Dp), lambda i: (i, 0)),
                    pl.BlockSpec((TB, Lp), lambda i: (i, 0)),
                    pl.BlockSpec((TB, Lp), lambda i: (i, 0)),
                ),
                compiler_params=pltpu.CompilerParams(
                    dimension_semantics=("parallel",)),
            )

        args = (xp, epsp, w1, b1, w2, b2, w3, b3, w4, b4)
        try:
            recon_p, mu_p, logvar_p = build(True)(*args)
        except Exception:
            # This jax build rejected single-buffered (Buffered(1)) invariant
            # weights; fall back to default double buffering (correctness
            # identical, ~1 MB extra VMEM at these shapes).
            recon_p, mu_p, logvar_p = build(False)(*args)

    # Strip batch / feature padding.
    return recon_p[:B, :D], mu_p[:B, :L], logvar_p[:B, :L]


# ----------------------------------------------------------------------------
# Pure-JAX f32 reference (correctness check only).
# ----------------------------------------------------------------------------
def vae_ref(params, x, eps):
    D = params["w1"].shape[0]
    x2 = x.reshape(-1, D).astype(jnp.float32)
    h1 = jax.nn.relu(x2 @ params["w1"] + params["b1"])
    mu = h1 @ params["w21"] + params["b21"]
    logvar = h1 @ params["w22"] + params["b22"]
    z = mu + eps * jnp.exp(0.5 * logvar)
    h3 = jax.nn.relu(z @ params["w3"] + params["b3"])
    recon = jax.nn.sigmoid(h3 @ params["w4"] + params["b4"])
    return recon, mu, logvar


# ----------------------------------------------------------------------------
# PyTorch-style Linear init: U(-1/sqrt(fan_in), 1/sqrt(fan_in)), stored (in, out).
# ----------------------------------------------------------------------------
def init_params(key, input_size):
    def linear(k, fan_in, fan_out):
        kw, kb = jax.random.split(k)
        bound = 1.0 / np.sqrt(fan_in)
        w = jax.random.uniform(kw, (fan_in, fan_out), jnp.float32, -bound, bound)
        b = jax.random.uniform(kb, (fan_out,), jnp.float32, -bound, bound)
        return w, b

    ks = jax.random.split(key, 5)
    w1, b1 = linear(ks[0], input_size, 400)
    w21, b21 = linear(ks[1], 400, 20)
    w22, b22 = linear(ks[2], 400, 20)
    w3, b3 = linear(ks[3], 20, 400)
    w4, b4 = linear(ks[4], 400, input_size)
    return dict(w1=w1, b1=b1, w21=w21, b21=b21, w22=w22, b22=b22,
                w3=w3, b3=b3, w4=w4, b4=b4)


if __name__ == "__main__":
    input_size = 256
    latent = 20

    key = jax.random.PRNGKey(0)
    pkey, xkey, ekey, xkey2, ekey2 = jax.random.split(key, 5)
    params = init_params(pkey, input_size)

    # Tolerance covers bf16 MXU operands (f32 accumulation) vs the f32 XLA
    # reference; the padding scheme itself introduces no error.
    ATOL = RTOL = 3e-2

    # ---- Small image-like input (gridless single-block path): (2,4,16,16)
    # flattens to (8, 256), exactly like x.view(-1, input_size) in torch.
    x = jax.random.normal(xkey, (2, 4, 16, 16), jnp.float32)
    B = x.size // input_size
    # TODO(synk): torch.randn_like(std) has no deterministic in-kernel
    # equivalent here; the noise is sampled once with a fixed JAX key and fed
    # to both the Pallas kernel and the reference so results are comparable.
    eps = jax.random.normal(ekey, (B, latent), jnp.float32)

    recon, mu, logvar = jax.block_until_ready(vae_forward(params, x, eps))
    recon_r, mu_r, logvar_r = vae_ref(params, x, eps)

    assert recon.shape == (B, input_size), recon.shape
    assert mu.shape == (B, latent) and logvar.shape == (B, latent)
    np.testing.assert_allclose(np.asarray(mu), np.asarray(mu_r), atol=ATOL, rtol=RTOL)
    np.testing.assert_allclose(np.asarray(logvar), np.asarray(logvar_r), atol=ATOL, rtol=RTOL)
    np.testing.assert_allclose(np.asarray(recon), np.asarray(recon_r), atol=ATOL, rtol=RTOL)

    # ---- Larger batch to exercise the gridded, megacore-parallel path
    # (grid = 512/256 = 2 batch tiles).
    B2 = 512
    x_big = jax.random.normal(xkey2, (B2, input_size), jnp.float32)
    eps_big = jax.random.normal(ekey2, (B2, latent), jnp.float32)

    recon2, mu2, logvar2 = jax.block_until_ready(
        vae_forward(params, x_big, eps_big, batch_tile=256))
    recon2_r, mu2_r, logvar2_r = vae_ref(params, x_big, eps_big)

    assert recon2.shape == (B2, input_size)
    np.testing.assert_allclose(np.asarray(mu2), np.asarray(mu2_r), atol=ATOL, rtol=RTOL)
    np.testing.assert_allclose(np.asarray(logvar2), np.asarray(logvar2_r), atol=ATOL, rtol=RTOL)
    np.testing.assert_allclose(np.asarray(recon2), np.asarray(recon2_r), atol=ATOL, rtol=RTOL)

    print("KERNEL_OK")
</pallas_src>

<mosaic_0001>
module attributes {stable_mosaic.version = 11 : i64} {
  func.func @_vae_kernel(%arg0: memref<8x256xf32, #tpu.memory_space<vmem>>, %arg1: memref<8x128xf32, #tpu.memory_space<vmem>>, %arg2: memref<256x512xbf16, #tpu.memory_space<vmem>>, %arg3: memref<1x512xf32, #tpu.memory_space<vmem>>, %arg4: memref<512x256xbf16, #tpu.memory_space<vmem>>, %arg5: memref<1x256xf32, #tpu.memory_space<vmem>>, %arg6: memref<128x512xbf16, #tpu.memory_space<vmem>>, %arg7: memref<1x512xf32, #tpu.memory_space<vmem>>, %arg8: memref<512x256xbf16, #tpu.memory_space<vmem>>, %arg9: memref<1x256xf32, #tpu.memory_space<vmem>>, %arg10: memref<8x256xf32, #tpu.memory_space<vmem>>, %arg11: memref<8x128xf32, #tpu.memory_space<vmem>>, %arg12: memref<8x128xf32, #tpu.memory_space<vmem>>) attributes {dimension_semantics = [], scalar_prefetch = 0 : i64, scratch_operands = 0 : i64, tpu.core_type = #tpu.core_type<tc>} {
    %c0 = arith.constant 0 : index
    %c0_0 = arith.constant 0 : index
    %0 = vector.load %arg0[%c0, %c0_0] : memref<8x256xf32, #tpu.memory_space<vmem>>, vector<8x256xf32>
    %1 = arith.truncf %0 : vector<8x256xf32> to vector<8x256xbf16>
    %c0_1 = arith.constant 0 : index
    %c0_2 = arith.constant 0 : index
    %2 = vector.load %arg2[%c0_1, %c0_2] : memref<256x512xbf16, #tpu.memory_space<vmem>>, vector<256x512xbf16>
    %cst = arith.constant dense<0.000000e+00> : vector<8x512xf32>
    %3 = tpu.matmul %1, %2, %cst {dimension_numbers = #tpu.dot_dimension_numbers<[1], [0], [0], [1], [0, 0, 1, 1], [], []>} : vector<8x256xbf16>, vector<256x512xbf16>, vector<8x512xf32> -> vector<8x512xf32>
    %c0_3 = arith.constant 0 : index
    %c0_4 = arith.constant 0 : index
    %4 = vector.load %arg3[%c0_3, %c0_4] : memref<1x512xf32, #tpu.memory_space<vmem>>, vector<1x512xf32>
    %5 = vector.broadcast %4 : vector<1x512xf32> to vector<8x512xf32>
    %6 = arith.addf %3, %5 : vector<8x512xf32>
    %cst_5 = arith.constant 0.000000e+00 : f32
    %7 = vector.broadcast %cst_5 : f32 to vector<8x512xf32>
    %8 = arith.maximumf %6, %7 : vector<8x512xf32>
    %9 = arith.truncf %8 : vector<8x512xf32> to vector<8x512xbf16>
    %c0_6 = arith.constant 0 : index
    %c0_7 = arith.constant 0 : index
    %10 = vector.load %arg4[%c0_6, %c0_7] : memref<512x256xbf16, #tpu.memory_space<vmem>>, vector<512x256xbf16>
    %cst_8 = arith.constant dense<0.000000e+00> : vector<8x256xf32>
    %11 = tpu.matmul %9, %10, %cst_8 {dimension_numbers = #tpu.dot_dimension_numbers<[1], [0], [0], [1], [0, 0, 1, 1], [], []>} : vector<8x512xbf16>, vector<512x256xbf16>, vector<8x256xf32> -> vector<8x256xf32>
    %c0_9 = arith.constant 0 : index
    %c0_10 = arith.constant 0 : index
    %12 = vector.load %arg5[%c0_9, %c0_10] : memref<1x256xf32, #tpu.memory_space<vmem>>, vector<1x256xf32>
    %13 = vector.broadcast %12 : vector<1x256xf32> to vector<8x256xf32>
    %14 = arith.addf %11, %13 : vector<8x256xf32>
    %15 = vector.extract_strided_slice %14 {offsets = [0, 0], sizes = [8, 128], strides = [1, 1]} : vector<8x256xf32> to vector<8x128xf32>
    %16 = vector.extract_strided_slice %14 {offsets = [0, 128], sizes = [8, 128], strides = [1, 1]} : vector<8x256xf32> to vector<8x128xf32>
    %c0_11 = arith.constant 0 : index
    %c0_12 = arith.constant 0 : index
    %17 = vector.load %arg1[%c0_11, %c0_12] : memref<8x128xf32, #tpu.memory_space<vmem>>, vector<8x128xf32>
    %cst_13 = arith.constant 5.000000e-01 : f32
    %18 = vector.broadcast %cst_13 : f32 to vector<8x128xf32>
    %19 = arith.mulf %18, %16 : vector<8x128xf32>
    %20 = math.exp %19 : vector<8x128xf32>
    %21 = arith.mulf %17, %20 : vector<8x128xf32>
    %22 = arith.addf %15, %21 : vector<8x128xf32>
    %23 = arith.truncf %22 : vector<8x128xf32> to vector<8x128xbf16>
    %c0_14 = arith.constant 0 : index
    %c0_15 = arith.constant 0 : index
    %24 = vector.load %arg6[%c0_14, %c0_15] : memref<128x512xbf16, #tpu.memory_space<vmem>>, vector<128x512xbf16>
    %cst_16 = arith.constant dense<0.000000e+00> : vector<8x512xf32>
    %25 = tpu.matmul %23, %24, %cst_16 {dimension_numbers = #tpu.dot_dimension_numbers<[1], [0], [0], [1], [0, 0, 1, 1], [], []>} : vector<8x128xbf16>, vector<128x512xbf16>, vector<8x512xf32> -> vector<8x512xf32>
    %c0_17 = arith.constant 0 : index
    %c0_18 = arith.constant 0 : index
    %26 = vector.load %arg7[%c0_17, %c0_18] : memref<1x512xf32, #tpu.memory_space<vmem>>, vector<1x512xf32>
    %27 = vector.broadcast %26 : vector<1x512xf32> to vector<8x512xf32>
    %28 = arith.addf %25, %27 : vector<8x512xf32>
    %cst_19 = arith.constant 0.000000e+00 : f32
    %29 = vector.broadcast %cst_19 : f32 to vector<8x512xf32>
    %30 = arith.maximumf %28, %29 : vector<8x512xf32>
    %31 = arith.truncf %30 : vector<8x512xf32> to vector<8x512xbf16>
    %c0_20 = arith.constant 0 : index
    %c0_21 = arith.constant 0 : index
    %32 = vector.load %arg8[%c0_20, %c0_21] : memref<512x256xbf16, #tpu.memory_space<vmem>>, vector<512x256xbf16>
    %cst_22 = arith.constant dense<0.000000e+00> : vector<8x256xf32>
    %33 = tpu.matmul %31, %32, %cst_22 {dimension_numbers = #tpu.dot_dimension_numbers<[1], [0], [0], [1], [0, 0, 1, 1], [], []>} : vector<8x512xbf16>, vector<512x256xbf16>, vector<8x256xf32> -> vector<8x256xf32>
    %c0_23 = arith.constant 0 : index
    %c0_24 = arith.constant 0 : index
    %34 = vector.load %arg9[%c0_23, %c0_24] : memref<1x256xf32, #tpu.memory_space<vmem>>, vector<1x256xf32>
    %35 = vector.broadcast %34 : vector<1x256xf32> to vector<8x256xf32>
    %36 = arith.addf %33, %35 : vector<8x256xf32>
    %37 = arith.negf %36 : vector<8x256xf32>
    %38 = math.exp %37 : vector<8x256xf32>
    %cst_25 = arith.constant 1.000000e+00 : f32
    %39 = vector.broadcast %cst_25 : f32 to vector<8x256xf32>
    %40 = arith.addf %39, %38 : vector<8x256xf32>
    %41 = arith.divf %39, %40 : vector<8x256xf32>
    %c0_26 = arith.constant 0 : index
    %c0_27 = arith.constant 0 : index
    %42 = vector.load %arg10[%c0_26, %c0_27] : memref<8x256xf32, #tpu.memory_space<vmem>>, vector<8x256xf32>
    tpu.vector_store %arg10[%c0_26, %c0_27], %41 {strides = array<i32>} : memref<8x256xf32, #tpu.memory_space<vmem>>, vector<8x256xf32>,
    %c0_28 = arith.constant 0 : index
    %c0_29 = arith.constant 0 : index
    %43 = vector.load %arg11[%c0_28, %c0_29] : memref<8x128xf32, #tpu.memory_space<vmem>>, vector<8x128xf32>
    tpu.vector_store %arg11[%c0_28, %c0_29], %15 {strides = array<i32>} : memref<8x128xf32, #tpu.memory_space<vmem>>, vector<8x128xf32>,
    %c0_30 = arith.constant 0 : index
    %c0_31 = arith.constant 0 : index
    %44 = vector.load %arg12[%c0_30, %c0_31] : memref<8x128xf32, #tpu.memory_space<vmem>>, vector<8x128xf32>
    tpu.vector_store %arg12[%c0_30, %c0_31], %16 {strides = array<i32>} : memref<8x128xf32, #tpu.memory_space<vmem>>, vector<8x128xf32>,
    return
  }
}

</mosaic_0001>

<bundles_post_ra>
// kernel: tpu_custom_call.1
= control target key start
LH: loop header
LB: loop body
LE: loop exit
PB: predicated region body
PF: predicated region fallthrough
CT: control target
= control target key end

     0   :  { %18 = vsyncpa [#allocation3], 0  ;;  %s3557_s0 = inlined_call_operand.hbm [shape: f32[8,256], index: 0, kind: input, shape index: {}]   ;;  %s3558_s1 = inlined_call_operand.hbm [shape: f32[8,128], index: 1, kind: input, shape index: {}]   ;;  %s3559_s2 = inlined_call_operand.hbm [shape: bf16[256,512], index: 2, kind: input, shape index: {}]   ;;  %s3560_s3 = inlined_call_operand.hbm [shape: f32[1,512], index: 3, kind: input, shape index: {}]   ;;  %s3561_s4 = inlined_call_operand.hbm [shape: bf16[512,256], index: 4, kind: input, shape index: {}]   ;;  %s3562_s5 = inlined_call_operand.vmem [shape: f32[1,256], index: 5, kind: input, shape index: {}]   ;;  %s3563_s6 = inlined_call_operand.hbm [shape: bf16[128,512], index: 6, kind: input, shape index: {}]   ;;  %s3564_s7 = inlined_call_operand.vmem [shape: f32[1,512], index: 7, kind: input, shape index: {}]   ;;  %s3565_s8 = inlined_call_operand.hbm [shape: bf16[512,256], index: 8, kind: input, shape index: {}]   ;;  %s3566_s9 = inlined_call_operand.vmem [shape: f32[1,256], index: 9, kind: input, shape index: {}]   ;;  %s3567_s10 = inlined_call_operand.hbm [shape: f32[8,256], index: 10, kind: output, shape index: {0}]   ;;  %s3568_s11 = inlined_call_operand.hbm [shape: f32[8,128], index: 11, kind: output, shape index: {1}]   ;;  %s3569_s12 = inlined_call_operand.hbm [shape: f32[8,128], index: 12, kind: output, shape index: {2}]  }
   0x1   :  { %19 = vsyncpa [#allocation6], 0 }
   0x2   :  { %20 = vsyncpa [#allocation9], 0 }
   0x3   :  { %21 = vsyncpa [#allocation12], 0 }
   0x4   :  { %22 = vsyncpa [#allocation4], 0  ;;  %s40_s23 = sshll.u32 %s3558_s1, 4  ;;  %s41_s23 = int_to_ptr.hbm [resolvable:$true] %s40_s23 }
   0x5   :  { %23 = vsyncpa [#allocation16], 0  ;;  %s3401_s24 = smov [#allocation5]   ;;  %s64_s28 = sshll.u32 %s3560_s3, 4  ;;  %s65_s28 = int_to_ptr.hbm [resolvable:$true] %s64_s28 }
   0x6   :  { %s42_s25 = sshll.u32 %s3401_s24, 4  ;;  %s3402_s29 = smov [#allocation8]   ;;  %s43_s25 = int_to_ptr.vmem [resolvable:$true] %s42_s25 }
   0x7   :  { %45 = dma.hbm_to_vmem [thread:$0]  %s41_s23, 128, %s43_s25, [#allocation6]  }
   0x8   :  { %s66_s30 = sshll.u32 %s3402_s29, 4  ;;  %s89_s15 = sshll.u32 %s3563_s6, 4  ;;  %s67_s30 = int_to_ptr.vmem [resolvable:$true] %s66_s30  ;;  %s90_s15 = int_to_ptr.hbm [resolvable:$true] %s89_s15 }
   0x9   :  { %69 = dma.hbm_to_vmem [thread:$0]  %s65_s28, 64, %s67_s30, [#allocation9]  }
   0xa   :  { %s3403_s1 = smov [#allocation11]   ;;  %s29_s19 = sshll.u32 %s3557_s0, 4  ;;  %s30_s19 = int_to_ptr.hbm [resolvable:$true] %s29_s19 }
   0xb   :  { %s91_s16 = sshll.u32 %s3403_s1, 4  ;;  %s3404_s20 = smov 256   ;;  %s92_s16 = int_to_ptr.vmem [resolvable:$true] %s91_s16 }
   0xc   :  { %s3405_s3 = smov 16   ;;  %s3406_s21 = smov [#allocation2]  }
   0xd   :  { %97 = dma.hbm_to_vmem [thread:$0]  %s90_s15, 4096, %s92_s16, [#allocation12], %s3404_s20, %s3404_s20, %s3405_s3  }
   0xe   :  { %s31_s22 = sshll.u32 %s3406_s21, 4  ;;  %s50_s25 = sshll.u32 %s3559_s2, 4  ;;  %s32_s22 = int_to_ptr.vmem [resolvable:$true] %s31_s22  ;;  %s51_s25 = int_to_ptr.hbm [resolvable:$true] %s50_s25 }
   0xf   :  { %34 = dma.hbm_to_vmem [thread:$0]  %s30_s19, 256, %s32_s22, [#allocation3]  }
  0x10   :  { %s74_s27 = sshll.u32 %s3561_s4, 4  ;;  %s3407_s28 = smov [#allocation7]   ;;  %s75_s27 = int_to_ptr.hbm [resolvable:$true] %s74_s27 }
  0x11   :  { %s52_s29 = sshll.u32 %s3407_s28, 4  ;;  %s3408_s0 = smov [#allocation10]   ;;  %s53_s29 = int_to_ptr.vmem [resolvable:$true] %s52_s29 }
  0x12   :  { %58 = dma.hbm_to_vmem [thread:$0]  %s51_s25, 8192, %s53_s29, [#allocation6], %s3404_s20, %s3404_s20, %s3405_s3  }
  0x13   :  { %s76_s30 = sshll.u32 %s3408_s0, 4  ;;  %s3409_s13 = smov 128   ;;  %s77_s30 = int_to_ptr.vmem [resolvable:$true] %s76_s30 }
  0x14   :  { %s3410_s14 = smov 8   ;;  %s104_s1 = sshll.u32 %s3565_s8, 4  ;;  %s105_s1 = int_to_ptr.hbm [resolvable:$true] %s104_s1 }
  0x15   :  { %82 = dma.hbm_to_vmem [thread:$0]  %s75_s27, 8192, %s77_s30, [#allocation9], %s3409_s13, %s3409_s13, %s3410_s14  }
  0x16   :  { %s3411_s16 = smov [#allocation13]  }
  0x17   :  { %s106_s17 = sshll.u32 %s3411_s16, 4  ;;  %s107_s17 = int_to_ptr.vmem [resolvable:$true] %s106_s17 }
  0x18   :  { %112 = dma.hbm_to_vmem [thread:$0]  %s105_s1, 8192, %s107_s17, [#allocation12], %s3409_s13, %s3409_s13, %s3410_s14  }
  0x19   :  { %3389 = dma.done.wait [#allocation3], 256  }
  0x1a   :  { %3390 = vsyncadd [#allocation3], 4294967040 }
  0x1b   :  { %3391 = dma.done.wait [#allocation6], 8320  }
  0x1c   :  { %3392 = vsyncadd [#allocation6], 4294958976 }
  0x1d   :  { %3393 = dma.done.wait [#allocation9], 8256  }
  0x1e   :  { %3394 = vsyncadd [#allocation9], 4294959040 }
  0x1f   :  { %3395 = dma.done.wait [#allocation12], 12288  }
  0x20   :  { %3396 = vsyncadd [#allocation12], 4294955008  ;;  %v2117_v0 = vld [vmem:[#allocation7 + $0xe0] sm:$0xf]  ;;  %v2931_v1 = vld [vmem:[#allocation7 + $0xec] sm:$0xf0] }
  0x21   :  { %v2245_v2 = vld [vmem:[#allocation7 + $0x1e0] sm:$0xf]  ;;  %v2118_v3 = vor.u32 %v2931_v1, %v2117_v0  ;;  %v2963_v4 = vld [vmem:[#allocation7 + $0x1ec] sm:$0xf0]  ;;  %v2929_v5 = vld [vmem:[#allocation7 + $0xe4] sm:$0xf] }
  0x22   :  { %v2119_v6 = vld [vmem:[#allocation7 + $0xf0] sm:$0xf0]  ;;  %v2246_v7 = vor.u32 %v2963_v4, %v2245_v2  ;;  %v2961_v9 = vld [vmem:[#allocation7 + $0x1e4] sm:$0xf]  ;;  %v2101_v11 = vld [vmem:[#allocation7 + $0xc0] sm:$0xf] }
  0x23   :  { %v2122_v8 = vor.u32 %v2929_v5, %v2119_v6  ;;  %v2247_v10 = vld [vmem:[#allocation7 + $0x1f0] sm:$0xf0]  ;;  %541 = vmatpush.bf16.msra.mxu0 %v2118_v3  ;;  %v2927_v13 = vld [vmem:[#allocation7 + $0xcc] sm:$0xf0]  ;;  %v2229_v14 = vld [vmem:[#allocation7 + $0x1c0] sm:$0xf] }
  0x24   :  { %v2250_v12 = vor.u32 %v2961_v9, %v2247_v10  ;;  %v2959_v15 = vld [vmem:[#allocation7 + $0x1cc] sm:$0xf0]  ;;  %554 = vmatpush.bf16.msra.mxu1 %v2246_v7  ;;  %v2102_v16 = vor.u32 %v2927_v13, %v2101_v11  ;;  %v2925_v18 = vld [vmem:[#allocation7 + $0xc4] sm:$0xf]  ;;  %v2103_v19 = vld [vmem:[#allocation7 + $0xd0] sm:$0xf0] }
  0x25   :  { %567 = vmatpush.bf16.msra.mxu2 %v2122_v8  ;;  %v2230_v17 = vor.u32 %v2959_v15, %v2229_v14  ;;  %v2957_v20 = vld [vmem:[#allocation7 + $0x1c4] sm:$0xf]  ;;  %v2106_v21 = vor.u32 %v2925_v18, %v2103_v19  ;;  %v2231_v22 = vld [vmem:[#allocation7 + $0x1d0] sm:$0xf0]  ;;  %v2085_v23 = vld [vmem:[#allocation7 + $0xa0] sm:$0xf] }
  0x26   :  { %580 = vmatpush.bf16.msra.mxu3 %v2250_v12  ;;  %v2923_v24 = vld [vmem:[#allocation7 + $0xac] sm:$0xf0]  ;;  %v2234_v25 = vor.u32 %v2957_v20, %v2231_v22  ;;  %v2213_v26 = vld [vmem:[#allocation7 + $0x1a0] sm:$0xf]  ;;  %v2921_v28 = vld [vmem:[#allocation7 + $0xa4] sm:$0xf] }
  0x27   :  { %v2955_v27 = vld [vmem:[#allocation7 + $0x1ac] sm:$0xf0]  ;;  %542 = vmatpush.bf16.msra.mxu0 %v2102_v16  ;;  %v2086_v29 = vor.u32 %v2923_v24, %v2085_v23  ;;  %v2087_v30 = vld [vmem:[#allocation7 + $0xb0] sm:$0xf0]  ;;  %v2953_v31 = vld [vmem:[#allocation7 + $0x1a4] sm:$0xf] }
  0x28   :  { %v2215_v32 = vld [vmem:[#allocation7 + $0x1b0] sm:$0xf0]  ;;  %555 = vmatpush.bf16.msra.mxu1 %v2230_v17  ;;  %v2214_v33 = vor.u32 %v2955_v27, %v2213_v26  ;;  %v2090_v34 = vor.u32 %v2921_v28, %v2087_v30  ;;  %v2069_v35 = vld [vmem:[#allocation7 + $0x80] sm:$0xf]  ;;  %v2919_v36 = vld [vmem:[#allocation7 + $0x8c] sm:$0xf0] }
  0x29   :  { %568 = vmatpush.bf16.msra.mxu2 %v2106_v21  ;;  %v2197_v37 = vld [vmem:[#allocation7 + $0x180] sm:$0xf]  ;;  %v2218_v38 = vor.u32 %v2953_v31, %v2215_v32  ;;  %v2951_v39 = vld [vmem:[#allocation7 + $0x18c] sm:$0xf0]  ;;  %v2917_v40 = vld [vmem:[#allocation7 + $0x84] sm:$0xf]  ;;  %v2070_v44 = vor.u32 %v2919_v36, %v2069_v35 }
  0x2a   :  { %581 = vmatpush.bf16.msra.mxu3 %v2234_v25  ;;  %v2071_v41 = vld [vmem:[#allocation7 + $0x90] sm:$0xf0]  ;;  %v2949_v42 = vld [vmem:[#allocation7 + $0x184] sm:$0xf]  ;;  %v2198_v45 = vor.u32 %v2951_v39, %v2197_v37  ;;  %v2053_v47 = vld [vmem:[#allocation7 + $0x60] sm:$0xf] }
  0x2b   :  { %v2199_v43 = vld [vmem:[#allocation7 + $0x190] sm:$0xf0]  ;;  %543 = vmatpush.bf16.msra.mxu0 %v2086_v29  ;;  %v2074_v46 = vor.u32 %v2917_v40, %v2071_v41  ;;  %v2915_v48 = vld [vmem:[#allocation7 + $0x6c] sm:$0xf0]  ;;  %v2181_v49 = vld [vmem:[#allocation7 + $0x160] sm:$0xf] }
  0x2c   :  { %556 = vmatpush.bf16.msra.mxu1 %v2214_v33  ;;  %v2202_v50 = vor.u32 %v2949_v42, %v2199_v43  ;;  %v2947_v51 = vld [vmem:[#allocation7 + $0x16c] sm:$0xf0]  ;;  %v2913_v52 = vld [vmem:[#allocation7 + $0x64] sm:$0xf]  ;;  %v2055_v53 = vld [vmem:[#allocation7 + $0x70] sm:$0xf0]  ;;  %v2054_v56 = vor.u32 %v2915_v48, %v2053_v47 }
  0x2d   :  { %569 = vmatpush.bf16.msra.mxu2 %v2090_v34  ;;  %v2945_v54 = vld [vmem:[#allocation7 + $0x164] sm:$0xf]  ;;  %v2183_v55 = vld [vmem:[#allocation7 + $0x170] sm:$0xf0]  ;;  %v2182_v57 = vor.u32 %v2947_v51, %v2181_v49  ;;  %v2058_v58 = vor.u32 %v2913_v52, %v2055_v53  ;;  %v2037_v59 = vld [vmem:[#allocation7 + $0x40] sm:$0xf] }
  0x2e   :  { %582 = vmatpush.bf16.msra.mxu3 %v2218_v38  ;;  %v2911_v60 = vld [vmem:[#allocation7 + $0x4c] sm:$0xf0]  ;;  %v2165_v61 = vld [vmem:[#allocation7 + $0x140] sm:$0xf]  ;;  %v2186_v62 = vor.u32 %v2945_v54, %v2183_v55  ;;  %v2909_v0 = vld [vmem:[#allocation7 + $0x44] sm:$0xf] }
  0x2f   :  { %544 = vmatpush.bf16.msra.mxu0 %v2070_v44  ;;  %v2943_v63 = vld [vmem:[#allocation7 + $0x14c] sm:$0xf0]  ;;  %v2039_v1 = vld [vmem:[#allocation7 + $0x50] sm:$0xf0]  ;;  %v2941_v2 = vld [vmem:[#allocation7 + $0x144] sm:$0xf]  ;;  %v2038_v4 = vor.u32 %v2911_v60, %v2037_v59 }
  0x30   :  { %557 = vmatpush.bf16.msra.mxu1 %v2198_v45  ;;  %v2167_v3 = vld [vmem:[#allocation7 + $0x150] sm:$0xf0]  ;;  %v2166_v5 = vor.u32 %v2943_v63, %v2165_v61  ;;  %v2042_v6 = vor.u32 %v2909_v0, %v2039_v1  ;;  %v2021_v7 = vld [vmem:[#allocation7 + $0x20] sm:$0xf]  ;;  %v2907_v8 = vld [vmem:[#allocation7 + $0x2c] sm:$0xf0] }
  0x31   :  { %570 = vmatpush.bf16.msra.mxu2 %v2074_v46  ;;  %v2149_v9 = vld [vmem:[#allocation7 + $0x120] sm:$0xf]  ;;  %v2170_v10 = vor.u32 %v2941_v2, %v2167_v3  ;;  %v2939_v11 = vld [vmem:[#allocation7 + $0x12c] sm:$0xf0]  ;;  %v2905_v12 = vld [vmem:[#allocation7 + $0x24] sm:$0xf]  ;;  %v2022_v16 = vor.u32 %v2907_v8, %v2021_v7 }
  0x32   :  { %583 = vmatpush.bf16.msra.mxu3 %v2202_v50  ;;  %v2023_v13 = vld [vmem:[#allocation7 + $0x30] sm:$0xf0]  ;;  %v2937_v14 = vld [vmem:[#allocation7 + $0x124] sm:$0xf]  ;;  %v2005_v17 = vld [vmem:[#allocation7] sm:$0xf]  ;;  %v2150_v19 = vor.u32 %v2939_v11, %v2149_v9 }
  0x33   :  { %545 = vmatpush.bf16.msra.mxu0 %v2054_v56  ;;  %v2151_v15 = vld [vmem:[#allocation7 + $0x130] sm:$0xf0]  ;;  %v2903_v18 = vld [vmem:[#allocation7 + $0xc] sm:$0xf0]  ;;  %v2026_v20 = vor.u32 %v2905_v12, %v2023_v13  ;;  %v2133_v21 = vld [vmem:[#allocation7 + $0x100] sm:$0xf] }
  0x34   :  { %558 = vmatpush.bf16.msra.mxu1 %v2182_v57  ;;  %v2935_v22 = vld [vmem:[#allocation7 + $0x10c] sm:$0xf0]  ;;  %v2901_v23 = vld [vmem:[#allocation7 + $0x4] sm:$0xf]  ;;  %v2154_v24 = vor.u32 %v2937_v14, %v2151_v15  ;;  %v2007_v25 = vld [vmem:[#allocation7 + $0x10] sm:$0xf0]  ;;  %v2006_v31 = vor.u32 %v2903_v18, %v2005_v17 }
  0x35   :  { %571 = vmatpush.bf16.msra.mxu2 %v2058_v58  ;;  %v2933_v26 = vld [vmem:[#allocation7 + $0x104] sm:$0xf]  ;;  %v2135_v27 = vld [vmem:[#allocation7 + $0x110] sm:$0xf0]  ;;  %v2125_v28 = vld [vmem:[#allocation7 + $0xe8] sm:$0xf]  ;;  %v2134_v35 = vor.u32 %v2935_v22, %v2133_v21  ;;  %v2010_v36 = vor.u32 %v2901_v23, %v2007_v25 }
  0x36   :  { %584 = vmatpush.bf16.msra.mxu3 %v2186_v62  ;;  %v2932_v29 = vld [vmem:[#allocation7 + $0xf4] sm:$0xf0]  ;;  %v2253_v30 = vld [vmem:[#allocation7 + $0x1e8] sm:$0xf]  ;;  %v2930_v33 = vld [vmem:[#allocation7 + $0xec] sm:$0xf]  ;;  %v2138_v40 = vor.u32 %v2933_v26, %v2135_v27 }
  0x37   :  { %546 = vmatpush.bf16.msra.mxu0 %v2038_v4  ;;  %v2964_v32 = vld [vmem:[#allocation7 + $0x1f4] sm:$0xf0]  ;;  %v2127_v34 = vld [vmem:[#allocation7 + $0xf8] sm:$0xf0]  ;;  %v2962_v37 = vld [vmem:[#allocation7 + $0x1ec] sm:$0xf]  ;;  %v2126_v41 = vor.u32 %v2932_v29, %v2125_v28 }
  0x38   :  { %559 = vmatpush.bf16.msra.mxu1 %v2166_v5  ;;  %v2255_v38 = vld [vmem:[#allocation7 + $0x1f8] sm:$0xf0]  ;;  %v143_v39 = vld [vmem:[#allocation2] sm:$0xff]  ;;  %v144_v42 = vld [vmem:[#allocation2 + $0x8] sm:$0xff]  ;;  %v2254_v43 = vor.u32 %v2964_v32, %v2253_v30  ;;  %v2130_v44 = vor.u32 %v2930_v33, %v2127_v34  ;;  %s1970_s20 = sshll.u32 %s3568_s11, 4  ;;  %s3412_s3 = smov [#allocation15]   ;;  %s1971_s20 = int_to_ptr.hbm [resolvable:$true] %s1970_s20 }
  0x39   :  { %572 = vmatpush.bf16.msra.mxu2 %v2042_v6  ;;  %v2109_v45 = vld [vmem:[#allocation7 + $0xc8] sm:$0xf]  ;;  %v2928_v46 = vld [vmem:[#allocation7 + $0xd4] sm:$0xf0]  ;;  %v2258_v48 = vor.u32 %v2962_v37, %v2255_v38  ;;  %v3501_v49 = vpack.c.bf16 %v143_v39, %v143_v39  ;;  %v2926_v51 = vld [vmem:[#allocation7 + $0xcc] sm:$0xf]  ;;  %v3503_v53 = vpack.c.bf16 %v144_v42, %v144_v42 }
  0x3a   :  { %585 = vmatpush.bf16.msra.mxu3 %v2170_v10  ;;  %v2237_v47 = vld [vmem:[#allocation7 + $0x1c8] sm:$0xf]  ;;  %v2960_v50 = vld [vmem:[#allocation7 + $0x1d4] sm:$0xf0]  ;;  %v2111_v52 = vld [vmem:[#allocation7 + $0xd8] sm:$0xf0]  ;;  %v2110_v56 = vor.u32 %v2928_v46, %v2109_v45 }
  0x3b   :  { %547 = vmatpush.bf16.msra.mxu0 %v2022_v16  ;;  %v2958_v54 = vld [vmem:[#allocation7 + $0x1cc] sm:$0xf]  ;;  %v2239_v55 = vld [vmem:[#allocation7 + $0x1d8] sm:$0xf0]  ;;  %v2238_v57 = vor.u32 %v2960_v50, %v2237_v47  ;;  %v2114_v58 = vor.u32 %v2926_v51, %v2111_v52  ;;  %v2093_v59 = vld [vmem:[#allocation7 + $0xa8] sm:$0xf] }
  0x3c   :  { %560 = vmatpush.bf16.msra.mxu1 %v2150_v19  ;;  %v2924_v60 = vld [vmem:[#allocation7 + $0xb4] sm:$0xf0]  ;;  %v2221_v61 = vld [vmem:[#allocation7 + $0x1a8] sm:$0xf]  ;;  %v2242_v62 = vor.u32 %v2958_v54, %v2239_v55  ;;  %v2922_v0 = vld [vmem:[#allocation7 + $0xac] sm:$0xf] }
  0x3d   :  { %573 = vmatpush.bf16.msra.mxu2 %v2026_v20  ;;  %v2956_v63 = vld [vmem:[#allocation7 + $0x1b4] sm:$0xf0]  ;;  %v2095_v1 = vld [vmem:[#allocation7 + $0xb8] sm:$0xf0]  ;;  %v2954_v2 = vld [vmem:[#allocation7 + $0x1ac] sm:$0xf]  ;;  %v2094_v4 = vor.u32 %v2924_v60, %v2093_v59 }
  0x3e   :  { %586 = vmatpush.bf16.msra.mxu3 %v2154_v24  ;;  %v2223_v3 = vld [vmem:[#allocation7 + $0x1b8] sm:$0xf0]  ;;  %v2222_v5 = vor.u32 %v2956_v63, %v2221_v61  ;;  %v2098_v6 = vor.u32 %v2922_v0, %v2095_v1  ;;  %v2077_v7 = vld [vmem:[#allocation7 + $0x88] sm:$0xf]  ;;  %v2920_v8 = vld [vmem:[#allocation7 + $0x94] sm:$0xf0] }
  0x3f   :  { %548 = vmatpush.bf16.msra.mxu0 %v2006_v31  ;;  %v2205_v9 = vld [vmem:[#allocation7 + $0x188] sm:$0xf]  ;;  %v2226_v10 = vor.u32 %v2954_v2, %v2223_v3  ;;  %v2952_v11 = vld [vmem:[#allocation7 + $0x194] sm:$0xf0]  ;;  %v2918_v12 = vld [vmem:[#allocation7 + $0x8c] sm:$0xf]  ;;  %v2078_v16 = vor.u32 %v2920_v8, %v2077_v7 }
  0x40   :  { %561 = vmatpush.bf16.msra.mxu1 %v2134_v35  ;;  %v2079_v13 = vld [vmem:[#allocation7 + $0x98] sm:$0xf0]  ;;  %v2950_v14 = vld [vmem:[#allocation7 + $0x18c] sm:$0xf]  ;;  %v2206_v17 = vor.u32 %v2952_v11, %v2205_v9  ;;  %v2061_v19 = vld [vmem:[#allocation7 + $0x68] sm:$0xf] }
  0x41   :  { %574 = vmatpush.bf16.msra.mxu2 %v2010_v36  ;;  %v2207_v15 = vld [vmem:[#allocation7 + $0x198] sm:$0xf0]  ;;  %v2082_v18 = vor.u32 %v2918_v12, %v2079_v13  ;;  %v2916_v20 = vld [vmem:[#allocation7 + $0x74] sm:$0xf0]  ;;  %v2189_v21 = vld [vmem:[#allocation7 + $0x168] sm:$0xf] }
  0x42   :  { %587 = vmatpush.bf16.msra.mxu3 %v2138_v40  ;;  %549 = vmatmul.bf16.vlgmr.msra.gmra.mxu0 %v3501_v49  ;;  %v2210_v22 = vor.u32 %v2950_v14, %v2207_v15  ;;  %v2948_v23 = vld [vmem:[#allocation7 + $0x174] sm:$0xf0]  ;;  %v2914_v24 = vld [vmem:[#allocation7 + $0x6c] sm:$0xf]  ;;  %v2063_v25 = vld [vmem:[#allocation7 + $0x78] sm:$0xf0]  ;;  %v2062_v28 = vor.u32 %v2916_v20, %v2061_v19 }
  0x43   :  { %593 = vmatpush.bf16.msrb.mxu0 %v2126_v41  ;;  %562 = vmatmul.bf16.vlgmr.msra.gmra.mxu1 %v3503_v53  ;;  %v2946_v26 = vld [vmem:[#allocation7 + $0x16c] sm:$0xf]  ;;  %v2191_v27 = vld [vmem:[#allocation7 + $0x178] sm:$0xf0]  ;;  %v2190_v29 = vor.u32 %v2948_v23, %v2189_v21  ;;  %v2066_v30 = vor.u32 %v2914_v24, %v2063_v25  ;;  %v2045_v31 = vld [vmem:[#allocation7 + $0x48] sm:$0xf] }
  0x44   :  { %606 = vmatpush.bf16.msrb.mxu1 %v2254_v43  ;;  %575 = vmatmul.bf16.vlgmr.msra.gmra.mxu2 %v3501_v49  ;;  %v2912_v32 = vld [vmem:[#allocation7 + $0x54] sm:$0xf0]  ;;  %v2173_v33 = vld [vmem:[#allocation7 + $0x148] sm:$0xf]  ;;  %v2194_v34 = vor.u32 %v2946_v26, %v2191_v27  ;;  %v2910_v36 = vld [vmem:[#allocation7 + $0x4c] sm:$0xf] }
  0x45   :  { %619 = vmatpush.bf16.msrb.mxu2 %v2130_v44  ;;  %588 = vmatmul.bf16.vlgmr.msra.gmra.mxu3 %v3503_v53  ;;  %v2944_v35 = vld [vmem:[#allocation7 + $0x154] sm:$0xf0]  ;;  %v2047_v37 = vld [vmem:[#allocation7 + $0x58] sm:$0xf0]  ;;  %v2942_v38 = vld [vmem:[#allocation7 + $0x14c] sm:$0xf]  ;;  %v2046_v40 = vor.u32 %v2912_v32, %v2045_v31 }
  0x46   :  { %632 = vmatpush.bf16.msrb.mxu3 %v2258_v48  ;;  %v2175_v39 = vld [vmem:[#allocation7 + $0x158] sm:$0xf0]  ;;  %v2174_v41 = vor.u32 %v2944_v35, %v2173_v33  ;;  %v2050_v42 = vor.u32 %v2910_v36, %v2047_v37  ;;  %v2029_v43 = vld [vmem:[#allocation7 + $0x28] sm:$0xf]  ;;  %v2908_v44 = vld [vmem:[#allocation7 + $0x34] sm:$0xf0] }
  0x47   :  { %594 = vmatpush.bf16.msrb.mxu0 %v2110_v56  ;;  %v2157_v45 = vld [vmem:[#allocation7 + $0x128] sm:$0xf]  ;;  %v2178_v46 = vor.u32 %v2942_v38, %v2175_v39  ;;  %v2940_v47 = vld [vmem:[#allocation7 + $0x134] sm:$0xf0]  ;;  %v2906_v48 = vld [vmem:[#allocation7 + $0x2c] sm:$0xf]  ;;  %v2030_v54 = vor.u32 %v2908_v44, %v2029_v43 }
  0x48   :  { %607 = vmatpush.bf16.msrb.mxu1 %v2238_v57  ;;  %v2031_v50 = vld [vmem:[#allocation7 + $0x38] sm:$0xf0]  ;;  %v2938_v51 = vld [vmem:[#allocation7 + $0x12c] sm:$0xf]  ;;  %v2013_v55 = vld [vmem:[#allocation7 + $0x8] sm:$0xf]  ;;  %v2158_v56 = vor.u32 %v2940_v47, %v2157_v45 }
  0x49   :  { %620 = vmatpush.bf16.msrb.mxu2 %v2114_v58  ;;  %v2159_v52 = vld [vmem:[#allocation7 + $0x138] sm:$0xf0]  ;;  %v2034_v57 = vor.u32 %v2906_v48, %v2031_v50  ;;  %v2904_v58 = vld [vmem:[#allocation7 + $0x14] sm:$0xf0]  ;;  %v2141_v59 = vld [vmem:[#allocation7 + $0x108] sm:$0xf] }
  0x4a   :  { %633 = vmatpush.bf16.msrb.mxu3 %v2242_v62  ;;  %v2936_v60 = vld [vmem:[#allocation7 + $0x114] sm:$0xf0]  ;;  %v2162_v61 = vor.u32 %v2938_v51, %v2159_v52  ;;  %v2902_v62 = vld [vmem:[#allocation7 + $0xc] sm:$0xf]  ;;  %v2015_v63 = vld [vmem:[#allocation7 + $0x18] sm:$0xf0] }
  0x4b   :  { %595 = vmatpush.bf16.msrb.mxu0 %v2094_v4  ;;  %v2934_v0 = vld [vmem:[#allocation7 + $0x10c] sm:$0xf]  ;;  %v2143_v1 = vld [vmem:[#allocation7 + $0x118] sm:$0xf0]  ;;  %v2317_v2 = vld [vmem:[#allocation10 + $0x70] sm:$0xf]  ;;  %v2014_v4 = vor.u32 %v2904_v58, %v2013_v55  ;;  %v2142_v7 = vor.u32 %v2936_v60, %v2141_v59  ;;  %v2018_v8 = vor.u32 %v2902_v62, %v2015_v63 }
  0x4c   :  { %608 = vmatpush.bf16.msrb.mxu1 %v2222_v5  ;;  %v2980_v3 = vld [vmem:[#allocation10 + $0x74] sm:$0xf0]  ;;  %v2381_v5 = vld [vmem:[#allocation10 + $0xf0] sm:$0xf]  ;;  %v2146_v9 = vor.u32 %v2934_v0, %v2143_v1  ;;  %v2309_v13 = vld [vmem:[#allocation10 + $0x60] sm:$0xf] }
  0x4d   :  { %621 = vmatpush.bf16.msrb.mxu2 %v2098_v6  ;;  %v2996_v6 = vld [vmem:[#allocation10 + $0xf4] sm:$0xf0]  ;;  %v2445_v11 = vld [vmem:[#allocation10 + $0x170] sm:$0xf]  ;;  %v2978_v14 = vld [vmem:[#allocation10 + $0x64] sm:$0xf0] }
  0x4e   :  { %634 = vmatpush.bf16.msrb.mxu3 %v2226_v10  ;;  %v2318_v10 = vor.u32 %v2980_v3, %v2317_v2  ;;  %v3012_v12 = vld [vmem:[#allocation10 + $0x174] sm:$0xf0]  ;;  %v2382_v15 = vor.u32 %v2996_v6, %v2381_v5  ;;  %v2310_v19 = vor.u32 %v2978_v14, %v2309_v13  ;;  %v2437_v20 = vld [vmem:[#allocation10 + $0x160] sm:$0xf]  ;;  %v3010_v21 = vld [vmem:[#allocation10 + $0x164] sm:$0xf0] }
  0x4f   :  { %596 = vmatpush.bf16.msrb.mxu0 %v2078_v16  ;;  %v2373_v16 = vld [vmem:[#allocation10 + $0xe0] sm:$0xf]  ;;  %v2976_v23 = vld [vmem:[#allocation10 + $0x54] sm:$0xf0]  ;;  %v2365_v25 = vld [vmem:[#allocation10 + $0xd0] sm:$0xf]  ;;  %v2438_v27 = vor.u32 %v3010_v21, %v2437_v20 }
  0x50   :  { %609 = vmatpush.bf16.msrb.mxu1 %v2206_v17  ;;  %v2994_v17 = vld [vmem:[#allocation10 + $0xe4] sm:$0xf0]  ;;  %v2992_v26 = vld [vmem:[#allocation10 + $0xd4] sm:$0xf0]  ;;  %v2357_v32 = vld [vmem:[#allocation10 + $0xc0] sm:$0xf] }
  0x51   :  { %622 = vmatpush.bf16.msrb.mxu2 %v2082_v18  ;;  %v2446_v18 = vor.u32 %v3012_v12, %v2445_v11  ;;  %v2374_v24 = vor.u32 %v2994_v17, %v2373_v16  ;;  %v2366_v31 = vor.u32 %v2992_v26, %v2365_v25  ;;  %v2990_v33 = vld [vmem:[#allocation10 + $0xc4] sm:$0xf0]  ;;  %v2285_v35 = vld [vmem:[#allocation10 + $0x30] sm:$0xf]  ;;  %v2988_v38 = vld [vmem:[#allocation10 + $0xb4] sm:$0xf0] }
  0x52   :  { %635 = vmatpush.bf16.msrb.mxu3 %v2210_v22  ;;  %v2301_v22 = vld [vmem:[#allocation10 + $0x50] sm:$0xf]  ;;  %v2358_v36 = vor.u32 %v2990_v33, %v2357_v32  ;;  %v2277_v39 = vld [vmem:[#allocation10 + $0x20] sm:$0xf]  ;;  %v2986_v43 = vld [vmem:[#allocation10 + $0xa4] sm:$0xf0] }
  0x53   :  { %597 = vmatpush.bf16.msrb.mxu0 %v2062_v28  ;;  %v2302_v28 = vor.u32 %v2976_v23, %v2301_v22  ;;  %v2349_v37 = vld [vmem:[#allocation10 + $0xb0] sm:$0xf]  ;;  %v2984_v50 = vld [vmem:[#allocation10 + $0x94] sm:$0xf0]  ;;  %v2261_v52 = vld [vmem:[#allocation10] sm:$0xf] }
  0x54   :  { %610 = vmatpush.bf16.msrb.mxu1 %v2190_v29  ;;  %v2293_v29 = vld [vmem:[#allocation10 + $0x40] sm:$0xf]  ;;  %v2269_v45 = vld [vmem:[#allocation10 + $0x10] sm:$0xf]  ;;  %v2979_v55 = vld [vmem:[#allocation10 + $0x74] sm:$0xf] }
  0x55   :  { %623 = vmatpush.bf16.msrb.mxu2 %v2066_v30  ;;  %v2974_v30 = vld [vmem:[#allocation10 + $0x44] sm:$0xf0]  ;;  %v2333_v48 = vld [vmem:[#allocation10 + $0x90] sm:$0xf]  ;;  %v2325_v58 = vld [vmem:[#allocation10 + $0x80] sm:$0xf] }
  0x56   :  { %636 = vmatpush.bf16.msrb.mxu3 %v2194_v34  ;;  %v2294_v34 = vor.u32 %v2974_v30, %v2293_v29  ;;  %v2982_v59 = vld [vmem:[#allocation10 + $0x84] sm:$0xf0]  ;;  %v2977_v63 = vld [vmem:[#allocation10 + $0x64] sm:$0xf]  ;;  %v2311_v0 = vld [vmem:[#allocation10 + $0x68] sm:$0xf0] }
  0x57   :  { %598 = vmatpush.bf16.msrb.mxu0 %v2046_v40  ;;  %v2970_v40 = vld [vmem:[#allocation10 + $0x24] sm:$0xf0]  ;;  %v2326_v62 = vor.u32 %v2982_v59, %v2325_v58  ;;  %v2314_v1 = vor.u32 %v2977_v63, %v2311_v0  ;;  %v2509_v2 = vld [vmem:[#allocation10 + $0x1f0] sm:$0xf]  ;;  %v3028_v3 = vld [vmem:[#allocation10 + $0x1f4] sm:$0xf0] }
  0x58   :  { %611 = vmatpush.bf16.msrb.mxu1 %v2174_v41  ;;  %v2350_v41 = vor.u32 %v2988_v38, %v2349_v37  ;;  %v2278_v44 = vor.u32 %v2970_v40, %v2277_v39  ;;  %v2510_v5 = vor.u32 %v3028_v3, %v2509_v2  ;;  %v2383_v6 = vld [vmem:[#allocation10 + $0xf8] sm:$0xf0]  ;;  %v2501_v14 = vld [vmem:[#allocation10 + $0x1e0] sm:$0xf]  ;;  %v2993_v16 = vld [vmem:[#allocation10 + $0xe4] sm:$0xf] }
  0x59   :  { %624 = vmatpush.bf16.msrb.mxu2 %v2050_v42  ;;  %v2341_v42 = vld [vmem:[#allocation10 + $0xa0] sm:$0xf]  ;;  %v2303_v12 = vld [vmem:[#allocation10 + $0x58] sm:$0xf0]  ;;  %v3006_v21 = vld [vmem:[#allocation10 + $0x144] sm:$0xf0] }
  0x5a   :  { %637 = vmatpush.bf16.msrb.mxu3 %v2178_v46  ;;  %v2968_v46 = vld [vmem:[#allocation10 + $0x14] sm:$0xf0]  ;;  %v2342_v47 = vor.u32 %v2986_v43, %v2341_v42  ;;  %v2421_v20 = vld [vmem:[#allocation10 + $0x140] sm:$0xf]  ;;  %v2973_v22 = vld [vmem:[#allocation10 + $0x44] sm:$0xf] }
  0x5b   :  { %599 = vmatpush.bf16.msrb.mxu0 %v2030_v54  ;;  %v2270_v51 = vor.u32 %v2968_v46, %v2269_v45  ;;  %v2966_v54 = vld [vmem:[#allocation10 + $0x4] sm:$0xf0]  ;;  %v2422_v23 = vor.u32 %v3006_v21, %v2421_v20  ;;  %v2493_v26 = vld [vmem:[#allocation10 + $0x1d0] sm:$0xf]  ;;  %v2991_v29 = vld [vmem:[#allocation10 + $0xd4] sm:$0xf] }
  0x5c   :  { %612 = vmatpush.bf16.msrb.mxu1 %v2158_v56  ;;  %v2334_v56 = vor.u32 %v2984_v50, %v2333_v48  ;;  %v2262_v60 = vor.u32 %v2966_v54, %v2261_v52  ;;  %v2367_v30 = vld [vmem:[#allocation10 + $0xd8] sm:$0xf0]  ;;  %v2413_v32 = vld [vmem:[#allocation10 + $0x130] sm:$0xf]  ;;  %v3004_v33 = vld [vmem:[#allocation10 + $0x134] sm:$0xf0] }
  0x5d   :  { %625 = vmatpush.bf16.msrb.mxu2 %v2034_v57  ;;  %v2319_v57 = vld [vmem:[#allocation10 + $0x78] sm:$0xf0]  ;;  %v2485_v37 = vld [vmem:[#allocation10 + $0x1c0] sm:$0xf]  ;;  %v3022_v38 = vld [vmem:[#allocation10 + $0x1c4] sm:$0xf0] }
  0x5e   :  { %638 = vmatpush.bf16.msrb.mxu3 %v2162_v61  ;;  %v2322_v61 = vor.u32 %v2979_v55, %v2319_v57  ;;  %v2486_v39 = vor.u32 %v3022_v38, %v2485_v37  ;;  %v2359_v40 = vld [vmem:[#allocation10 + $0xc8] sm:$0xf0]  ;;  %v2405_v42 = vld [vmem:[#allocation10 + $0x120] sm:$0xf]  ;;  %v3002_v43 = vld [vmem:[#allocation10 + $0x124] sm:$0xf0] }
  0x5f   :  { %600 = vmatpush.bf16.msrb.mxu0 %v2014_v4  ;;  %v2995_v4 = vld [vmem:[#allocation10 + $0xf4] sm:$0xf]  ;;  %v2406_v45 = vor.u32 %v3002_v43, %v2405_v42  ;;  %v2279_v46 = vld [vmem:[#allocation10 + $0x28] sm:$0xf0]  ;;  %v2477_v48 = vld [vmem:[#allocation10 + $0x1b0] sm:$0xf] }
  0x60   :  { %613 = vmatpush.bf16.msrb.mxu1 %v2142_v7  ;;  %v2386_v7 = vor.u32 %v2995_v4, %v2383_v6  ;;  %v3020_v50 = vld [vmem:[#allocation10 + $0x1b4] sm:$0xf0]  ;;  %v2351_v54 = vld [vmem:[#allocation10 + $0xb8] sm:$0xf0]  ;;  %v2397_v55 = vld [vmem:[#allocation10 + $0x110] sm:$0xf] }
  0x61   :  { %626 = vmatpush.bf16.msrb.mxu2 %v2018_v8  ;;  %v2429_v8 = vld [vmem:[#allocation10 + $0x150] sm:$0xf]  ;;  %v2478_v52 = vor.u32 %v3020_v50, %v2477_v48  ;;  %v2967_v59 = vld [vmem:[#allocation10 + $0x14] sm:$0xf]  ;;  %v3018_v63 = vld [vmem:[#allocation10 + $0x1a4] sm:$0xf0] }
  0x62   :  { %639 = vmatpush.bf16.msrb.mxu3 %v2146_v9  ;;  %601 = vmatmul.bf16.vlgmr.msrb.gmra.mxu0 %v3501_v49  ;;  %v3008_v9 = vld [vmem:[#allocation10 + $0x154] sm:$0xf0]  ;;  %v2985_v0 = vld [vmem:[#allocation10 + $0xa4] sm:$0xf]  ;;  %v2389_v4 = vld [vmem:[#allocation10 + $0x100] sm:$0xf] }
  0x63   :  { %1043 = vmatpush.bf16.msra.mxu0 %v2318_v10  ;;  %614 = vmatmul.bf16.vlgmr.msrb.gmra.mxu1 %v3503_v53  ;;  %v2975_v10 = vld [vmem:[#allocation10 + $0x54] sm:$0xf]  ;;  %v2430_v11 = vor.u32 %v3008_v9, %v2429_v8  ;;  %v2965_v6 = vld [vmem:[#allocation10 + $0x4] sm:$0xf]  ;;  %v2263_v8 = vld [vmem:[#allocation10 + $0x8] sm:$0xf0] }
  0x64   :  { %1056 = vmatpush.bf16.msra.mxu1 %v2382_v15  ;;  %627 = vmatmul.bf16.vlgmr.msrb.gmra.mxu2 %v3501_v49  ;;  %v2972_v49 = vld [vmem:[#allocation10 + $0x34] sm:$0xf0]  ;;  %v2306_v13 = vor.u32 %v2975_v10, %v2303_v12  ;;  %v3026_v15 = vld [vmem:[#allocation10 + $0x1e4] sm:$0xf0]  ;;  %v3011_v9 = vld [vmem:[#allocation10 + $0x174] sm:$0xf] }
  0x65   :  { %640 = vmatmul.bf16.vlgmr.msrb.gmra.mxu3 %v3503_v53  ;;  %1069 = vmatpush.bf16.msra.mxu2 %v2446_v18  ;;  %v2286_v53 = vor.u32 %v2972_v49, %v2285_v35  ;;  %v2502_v17 = vor.u32 %v3026_v15, %v2501_v14  ;;  %v2375_v18 = vld [vmem:[#allocation10 + $0xe8] sm:$0xf0]  ;;  %v2414_v35 = vor.u32 %v3004_v33, %v2413_v32  ;;  %v2287_v49 = vld [vmem:[#allocation10 + $0x38] sm:$0xf0]  ;;  %v3016_v14 = vld [vmem:[#allocation10 + $0x194] sm:$0xf0] }
  0x66   :  { %1082 = vmatpush.bf16.msra.mxu3 %v2510_v5  ;;  %v2998_v5 = vld [vmem:[#allocation10 + $0x104] sm:$0xf0]  ;;  %v2447_v10 = vld [vmem:[#allocation10 + $0x178] sm:$0xf0]  ;;  %v2983_v15 = vld [vmem:[#allocation10 + $0x94] sm:$0xf] }
  0x67   :  { %1044 = vmatpush.bf16.msra.mxu0 %v2310_v19  ;;  %v2378_v19 = vor.u32 %v2993_v16, %v2375_v18  ;;  %v2450_v12 = vor.u32 %v3011_v9, %v2447_v10  ;;  %v3009_v20 = vld [vmem:[#allocation10 + $0x164] sm:$0xf]  ;;  %v2439_v21 = vld [vmem:[#allocation10 + $0x168] sm:$0xf0]  ;;  %v3007_v33 = vld [vmem:[#allocation10 + $0x154] sm:$0xf] }
  0x68   :  { %1057 = vmatpush.bf16.msra.mxu1 %v2374_v24  ;;  %v2295_v24 = vld [vmem:[#allocation10 + $0x48] sm:$0xf0]  ;;  %v3003_v50 = vld [vmem:[#allocation10 + $0x134] sm:$0xf]  ;;  %v3017_v9 = vld [vmem:[#allocation10 + $0x1a4] sm:$0xf] }
  0x69   :  { %1070 = vmatpush.bf16.msra.mxu2 %v2438_v27  ;;  %v2298_v25 = vor.u32 %v2973_v22, %v2295_v24  ;;  %v3024_v27 = vld [vmem:[#allocation10 + $0x1d4] sm:$0xf0]  ;;  %v2453_v22 = vld [vmem:[#allocation10 + $0x180] sm:$0xf]  ;;  %v3014_v24 = vld [vmem:[#allocation10 + $0x184] sm:$0xf0] }
  0x6a   :  { %1083 = vmatpush.bf16.msra.mxu3 %v2502_v17  ;;  %v2335_v17 = vld [vmem:[#allocation10 + $0x98] sm:$0xf0]  ;;  %v2503_v37 = vld [vmem:[#allocation10 + $0x1e8] sm:$0xf0]  ;;  %s1968_s21 = sshll.u32 %s3412_s3, 4  ;;  %s3413_s22 = smov [#allocation17]   ;;  %s1969_s21 = int_to_ptr.vmem [resolvable:$true] %s1968_s21 }
  0x6b   :  { %1045 = vmatpush.bf16.msra.mxu0 %v2302_v28  ;;  %v2494_v28 = vor.u32 %v3024_v27, %v2493_v26  ;;  %v2338_v18 = vor.u32 %v2983_v15, %v2335_v17  ;;  %v2327_v26 = vld [vmem:[#allocation10 + $0x88] sm:$0xf0]  ;;  %v2454_v27 = vor.u32 %v3014_v24, %v2453_v22  ;;  %s1979_s23 = sshll.u32 %s3413_s22, 4  ;;  %s1981_s6 = sshll.u32 %s3569_s12, 4  ;;  %s1980_s23 = int_to_ptr.vmem [resolvable:$true] %s1979_s23  ;;  %s1982_s6 = int_to_ptr.hbm [resolvable:$true] %s1981_s6 }
  0x6c   :  { %1058 = vmatpush.bf16.msra.mxu1 %v2366_v31  ;;  %v2370_v31 = vor.u32 %v2991_v29, %v2367_v30  ;;  %v3027_v29 = vld [vmem:[#allocation10 + $0x1f4] sm:$0xf]  ;;  %v2511_v30 = vld [vmem:[#allocation10 + $0x1f8] sm:$0xf0]  ;;  %v2455_v24 = vld [vmem:[#allocation10 + $0x188] sm:$0xf0] }
  0x6d   :  { %1071 = vmatpush.bf16.msra.mxu2 %v2430_v11  ;;  %v2266_v11 = vor.u32 %v2965_v6, %v2263_v8  ;;  %v2514_v32 = vor.u32 %v3027_v29, %v2511_v30  ;;  %v2399_v8 = vld [vmem:[#allocation10 + $0x118] sm:$0xf0]  ;;  %s1959_s29 = sshll.u32 %s3567_s10, 4  ;;  %s1960_s29 = int_to_ptr.hbm [resolvable:$true] %s1959_s29 }
  0x6e   :  { %1084 = vmatpush.bf16.msra.mxu3 %v2494_v28 }
  0x6f   :  { %1046 = vmatpush.bf16.msra.mxu0 %v2294_v34  ;;  %v2971_v34 = vld [vmem:[#allocation10 + $0x34] sm:$0xf] }
  0x70   :  { %1059 = vmatpush.bf16.msra.mxu1 %v2358_v36  ;;  %v2290_v36 = vor.u32 %v2971_v34, %v2287_v49  ;;  %v2431_v34 = vld [vmem:[#allocation10 + $0x158] sm:$0xf0] }
  0x71   :  { %1072 = vmatpush.bf16.msra.mxu2 %v2422_v23  ;;  %v2442_v23 = vor.u32 %v3009_v20, %v2439_v21  ;;  %v2463_v20 = vld [vmem:[#allocation10 + $0x198] sm:$0xf0] }
  0x72   :  { %1085 = vmatpush.bf16.msra.mxu3 %v2486_v39 }
  0x73   :  { %1047 = vmatpush.bf16.msra.mxu0 %v2286_v53  ;;  %v2989_v53 = vld [vmem:[#allocation10 + $0xc4] sm:$0xf] }
  0x74   :  { %1060 = vmatpush.bf16.msra.mxu1 %v2350_v41  ;;  %v2362_v41 = vor.u32 %v2989_v53, %v2359_v40  ;;  %v3005_v40 = vld [vmem:[#allocation10 + $0x144] sm:$0xf] }
  0x75   :  { %1073 = vmatpush.bf16.msra.mxu2 %v2414_v35  ;;  %v2434_v35 = vor.u32 %v3007_v33, %v2431_v34 }
  0x76   :  { %1086 = vmatpush.bf16.msra.mxu3 %v2478_v52 }
  0x77   :  { %1048 = vmatpush.bf16.msra.mxu0 %v2278_v44  ;;  %v2969_v44 = vld [vmem:[#allocation10 + $0x24] sm:$0xf] }
  0x78   :  { %1061 = vmatpush.bf16.msra.mxu1 %v2342_v47  ;;  %v2282_v47 = vor.u32 %v2969_v44, %v2279_v46  ;;  %v2495_v46 = vld [vmem:[#allocation10 + $0x1d8] sm:$0xf0] }
  0x79   :  { %1074 = vmatpush.bf16.msra.mxu2 %v2406_v45  ;;  %v3023_v45 = vld [vmem:[#allocation10 + $0x1d4] sm:$0xf] }
  0x7a   :  { %v2498_v48 = vor.u32 %v3023_v45, %v2495_v46  ;;  %v3059_v45 = vld [vmem:[#allocation11 + $0xec] sm:$0xf0]  ;;  %v3057_v46 = vld [vmem:[#allocation11 + $0xe4] sm:$0xf] }
  0x7b   :  { %1049 = vmatpush.bf16.msra.mxu0 %v2270_v51  ;;  %v2987_v51 = vld [vmem:[#allocation10 + $0xb4] sm:$0xf] }
  0x7c   :  { %1062 = vmatpush.bf16.msra.mxu1 %v2334_v56  ;;  %v3000_v56 = vld [vmem:[#allocation10 + $0x114] sm:$0xf0]  ;;  %v2354_v57 = vor.u32 %v2987_v51, %v2351_v54  ;;  %v2415_v51 = vld [vmem:[#allocation10 + $0x138] sm:$0xf0] }
  0x7d   :  { %v2398_v58 = vor.u32 %v3000_v56, %v2397_v55  ;;  %v2418_v55 = vor.u32 %v3003_v50, %v2415_v51  ;;  %v2637_v50 = vld [vmem:[#allocation11 + $0xe8] sm:$0xf]  ;;  %v3060_v51 = vld [vmem:[#allocation11 + $0xf4] sm:$0xf0] }
  0x7f   :  { %1050 = vmatpush.bf16.msra.mxu0 %v2262_v60  ;;  %v2271_v60 = vld [vmem:[#allocation10 + $0x18] sm:$0xf0]  ;;  %1075 = vmatpush.bf16.msra.mxu2 %v2398_v58 }
  0x80   :  { %1063 = vmatpush.bf16.msra.mxu1 %v2326_v62  ;;  %v2274_v62 = vor.u32 %v2967_v59, %v2271_v60  ;;  %v3021_v59 = vld [vmem:[#allocation10 + $0x1c4] sm:$0xf]  ;;  %v2487_v60 = vld [vmem:[#allocation10 + $0x1c8] sm:$0xf0] }
  0x83   :  { %1095 = vmatpush.bf16.msrb.mxu0 %v2322_v61  ;;  %v2469_v61 = vld [vmem:[#allocation10 + $0x1a0] sm:$0xf] }
  0x84   :  { %1108 = vmatpush.bf16.msrb.mxu1 %v2386_v7  ;;  %v2470_v2 = vor.u32 %v3018_v63, %v2469_v61  ;;  %v2390_v7 = vor.u32 %v2998_v5, %v2389_v4  ;;  %v3019_v4 = vld [vmem:[#allocation10 + $0x1b4] sm:$0xf]  ;;  %v2479_v5 = vld [vmem:[#allocation10 + $0x1b8] sm:$0xf0] }
  0x85   :  { %v2482_v6 = vor.u32 %v3019_v4, %v2479_v5  ;;  %v3054_v5 = vld [vmem:[#allocation11 + $0xcc] sm:$0xf] }
  0x86   :  { %1087 = vmatpush.bf16.msra.mxu3 %v2470_v2  ;;  %1076 = vmatpush.bf16.msra.mxu2 %v2390_v7  ;;  %v2999_v7 = vld [vmem:[#allocation10 + $0x114] sm:$0xf] }
  0x87   :  { %1096 = vmatpush.bf16.msrb.mxu0 %v2314_v1  ;;  %v2343_v1 = vld [vmem:[#allocation10 + $0xa8] sm:$0xf0] }
  0x88   :  { %1109 = vmatpush.bf16.msrb.mxu1 %v2378_v19  ;;  %v2346_v3 = vor.u32 %v2985_v0, %v2343_v1  ;;  %v3513_v19 = vld [vmem:[#allocation8] sm:$0xf]  ;;  %v3001_v0 = vld [vmem:[#allocation10 + $0x124] sm:$0xf]  ;;  %v2407_v1 = vld [vmem:[#allocation10 + $0x128] sm:$0xf0] }
  0x89   :  { %v214_v44 = vperm.slane %v3513_v19, 1  ;;  %v2410_v2 = vor.u32 %v3001_v0, %v2407_v1  ;;  %v2615_v0 = vld [vmem:[#allocation11 + $0xd0] sm:$0xf0]  ;;  %v2621_v1 = vld [vmem:[#allocation11 + $0xc8] sm:$0xf] }
  0x8a   :  { %1121 = vmatpush.bf16.msrb.mxu2 %v2450_v12  ;;  %v2471_v12 = vld [vmem:[#allocation10 + $0x1a8] sm:$0xf0] }
  0x8b   :  { %1097 = vmatpush.bf16.msrb.mxu0 %v2306_v13  ;;  %v2461_v13 = vld [vmem:[#allocation10 + $0x190] sm:$0xf] }
  0x8c   :  { %1110 = vmatpush.bf16.msrb.mxu1 %v2370_v31  ;;  %v2462_v16 = vor.u32 %v3016_v14, %v2461_v13  ;;  %v213_v31 = vperm.slane %v3513_v19, 0  ;;  %v2997_v13 = vld [vmem:[#allocation10 + $0x104] sm:$0xf]  ;;  %v2391_v14 = vld [vmem:[#allocation10 + $0x108] sm:$0xf0] }
  0x8d   :  { %v2394_v21 = vor.u32 %v2997_v13, %v2391_v14  ;;  %v2605_v13 = vld [vmem:[#allocation11 + $0xa8] sm:$0xf]  ;;  %v3052_v14 = vld [vmem:[#allocation11 + $0xb4] sm:$0xf0] }
  0x8e   :  { %1088 = vmatpush.bf16.msra.mxu3 %v2462_v16  ;;  %1122 = vmatpush.bf16.msrb.mxu2 %v2442_v23  ;;  %v2474_v16 = vor.u32 %v3017_v9, %v2471_v12  ;;  %v3013_v23 = vld [vmem:[#allocation10 + $0x184] sm:$0xf]  ;;  %v3051_v9 = vld [vmem:[#allocation11 + $0xac] sm:$0xf0]  ;;  %v2599_v12 = vld [vmem:[#allocation11 + $0xb0] sm:$0xf0] }
  0x8f   :  { %1098 = vmatpush.bf16.msrb.mxu0 %v2298_v25  ;;  %v2981_v25 = vld [vmem:[#allocation10 + $0x84] sm:$0xf] }
  0x90   :  { %1111 = vmatpush.bf16.msrb.mxu1 %v2362_v41  ;;  %v2330_v28 = vor.u32 %v2981_v25, %v2327_v26  ;;  %v2423_v41 = vld [vmem:[#allocation10 + $0x148] sm:$0xf0]  ;;  %v2458_v25 = vor.u32 %v3013_v23, %v2455_v24  ;;  %v215_v26 = vperm.slane %v3513_v19, 2  ;;  %v2581_v23 = vld [vmem:[#allocation11 + $0x80] sm:$0xf] }
  0x91   :  { %v2426_v43 = vor.u32 %v3005_v40, %v2423_v41  ;;  %v3047_v24 = vld [vmem:[#allocation11 + $0x8c] sm:$0xf0] }
  0x92   :  { %1089 = vmatpush.bf16.msra.mxu3 %v2454_v27  ;;  %1123 = vmatpush.bf16.msrb.mxu2 %v2434_v35 }
  0x93   :  { %1099 = vmatpush.bf16.msrb.mxu0 %v2290_v36  ;;  %v3025_v36 = vld [vmem:[#allocation10 + $0x1e4] sm:$0xf] }
  0x94   :  { %1112 = vmatpush.bf16.msrb.mxu1 %v2354_v57  ;;  %v2506_v39 = vor.u32 %v3025_v36, %v2503_v37 }
  0x96   :  { %1134 = vmatpush.bf16.msrb.mxu3 %v2514_v32  ;;  %1124 = vmatpush.bf16.msrb.mxu2 %v2426_v43 }
  0x97   :  { %1100 = vmatpush.bf16.msrb.mxu0 %v2282_v47 }
  0x98   :  { %1113 = vmatpush.bf16.msrb.mxu1 %v2346_v3 }
  0x9a   :  { %1135 = vmatpush.bf16.msrb.mxu3 %v2506_v39  ;;  %1125 = vmatpush.bf16.msrb.mxu2 %v2418_v55  ;;  %v2638_v55 = vor.u32 %v3060_v51, %v2637_v50  ;;  %v2549_v50 = vld [vmem:[#allocation11 + $0x40] sm:$0xf]  ;;  %v3039_v51 = vld [vmem:[#allocation11 + $0x4c] sm:$0xf0] }
  0x9b   :  { %1101 = vmatpush.bf16.msrb.mxu0 %v2274_v62  ;;  %v2490_v62 = vor.u32 %v3021_v59, %v2487_v60  ;;  %v2613_v60 = vld [vmem:[#allocation11 + $0xc0] sm:$0xf] }
  0x9c   :  { %1114 = vmatpush.bf16.msrb.mxu1 %v2338_v18  ;;  %v3015_v18 = vld [vmem:[#allocation10 + $0x194] sm:$0xf] }
  0x9d   :  { %v2466_v22 = vor.u32 %v3015_v18, %v2463_v20  ;;  %v2607_v18 = vld [vmem:[#allocation11 + $0xb8] sm:$0xf0] }
  0x9e   :  { %1136 = vmatpush.bf16.msrb.mxu3 %v2498_v48  ;;  %1126 = vmatpush.bf16.msrb.mxu2 %v2410_v2  ;;  %v2631_v48 = vld [vmem:[#allocation11 + $0xf0] sm:$0xf0]  ;;  %v3056_v2 = vld [vmem:[#allocation11 + $0xd4] sm:$0xf0] }
  0x9f   :  { %1102 = vmatpush.bf16.msrb.mxu0 %v2266_v11  ;;  %v2402_v11 = vor.u32 %v2999_v7, %v2399_v8  ;;  %v2622_v4 = vor.u32 %v3056_v2, %v2621_v1  ;;  %v2597_v8 = vld [vmem:[#allocation11 + $0xa0] sm:$0xf] }
  0xa0   :  { %1115 = vmatpush.bf16.msrb.mxu1 %v2330_v28  ;;  %v2533_v1 = vld [vmem:[#allocation11 + $0x20] sm:$0xf] }
  0xa2   :  { %1137 = vmatpush.bf16.msrb.mxu3 %v2490_v62  ;;  %1127 = vmatpush.bf16.msrb.mxu2 %v2402_v11  ;;  %v3053_v62 = vld [vmem:[#allocation11 + $0xc4] sm:$0xf]  ;;  %v2598_v11 = vor.u32 %v3051_v9, %v2597_v8  ;;  %v2541_v8 = vld [vmem:[#allocation11 + $0x28] sm:$0xf]  ;;  %v3036_v9 = vld [vmem:[#allocation11 + $0x34] sm:$0xf0] }
  0xa6   :  { %1138 = vmatpush.bf16.msrb.mxu3 %v2482_v6  ;;  %1128 = vmatpush.bf16.msrb.mxu2 %v2394_v21  ;;  %v2623_v6 = vld [vmem:[#allocation11 + $0xd8] sm:$0xf0] }
  0xa7   :  { %v2626_v7 = vor.u32 %v3054_v5, %v2623_v6  ;;  %v2535_v5 = vld [vmem:[#allocation11 + $0x30] sm:$0xf0] }
  0xaa   :  { %1139 = vmatpush.bf16.msrb.mxu3 %v2474_v16  ;;  %v2606_v16 = vor.u32 %v3052_v14, %v2605_v13  ;;  %v3031_v13 = vld [vmem:[#allocation11 + $0xc] sm:$0xf0] }
  0xae   :  { %1140 = vmatpush.bf16.msrb.mxu3 %v2466_v22 }
  0xb2   :  { %1141 = vmatpush.bf16.msrb.mxu3 %v2458_v25  ;;  %v3045_v25 = vld [vmem:[#allocation11 + $0x84] sm:$0xf] }
  0xbf   :  { %v550_v49 = vpop.f32.mrf.mxu0 }
  0xc0   :  { %v551_v38 = vadd.f32 %v550_v49, %v213_v31  ;;  %v563_v53 = vpop.f32.mrf.mxu1  ;;  %v216_v31 = vperm.slane %v3513_v19, 3 }
  0xc2   :  { %v564_v42 = vadd.f32 %v563_v53, %v551_v38 }
  0xc4   :  { %v645_v47 = vmax.f32 %v564_v42, 0.0 }
  0xc6   :  { %v649_v52 = vpack.c.bf16 %v645_v47, %v645_v47 }
  0xc7   :  { %v576_v54 = vpop.f32.mrf.mxu2  ;;  %v552_v58 = vpop.f32.mrf.mxu0 }
  0xc8   :  { %v577_v56 = vadd.f32 %v576_v54, %v214_v44  ;;  %v589_v57 = vpop.f32.mrf.mxu3  ;;  %1051 = vmatmul.bf16.vlgmr.msra.gmra.mxu0 %v649_v52  ;;  %v565_v61 = vpop.f32.mrf.mxu1  ;;  %v2629_v44 = vld [vmem:[#allocation11 + $0xe0] sm:$0xf]  ;;  %v2634_v54 = vor.u32 %v3057_v46, %v2631_v48  ;;  %v3042_v46 = vld [vmem:[#allocation11 + $0x6c] sm:$0xf] }
  0xc9   :  { %v2630_v47 = vor.u32 %v3059_v45, %v2629_v44  ;;  %v3055_v61 = vld [vmem:[#allocation11 + $0xcc] sm:$0xf0] }
  0xca   :  { %v590_v63 = vadd.f32 %v589_v57, %v577_v56  ;;  %v3058_v56 = vld [vmem:[#allocation11 + $0xec] sm:$0xf]  ;;  %v2639_v57 = vld [vmem:[#allocation11 + $0xf8] sm:$0xf0] }
  0xcb   :  { %1356 = vmatpush.bf16.msra.mxu0 %v2630_v47  ;;  %v2642_v59 = vor.u32 %v3058_v56, %v2639_v57  ;;  %v2575_v47 = vld [vmem:[#allocation11 + $0x78] sm:$0xf0]  ;;  %v2557_v56 = vld [vmem:[#allocation11 + $0x48] sm:$0xf]  ;;  %v3040_v57 = vld [vmem:[#allocation11 + $0x54] sm:$0xf0] }
  0xcc   :  { %v646_v3 = vmax.f32 %v590_v63, 0.0  ;;  %v2614_v63 = vor.u32 %v3055_v61, %v2613_v60  ;;  %v2578_v48 = vor.u32 %v3042_v46, %v2575_v47  ;;  %v2893_v46 = vld [vmem:[#allocation13 + $0x1f0] sm:$0xf]  ;;  %v3124_v47 = vld [vmem:[#allocation13 + $0x1f4] sm:$0xf0] }
  0xce   :  { %v650_v10 = vpack.c.bf16 %v646_v3, %v646_v3  ;;  %v2618_v3 = vor.u32 %v3053_v62, %v2615_v0  ;;  %v2558_v62 = vor.u32 %v3040_v57, %v2557_v56  ;;  %v2559_v0 = vld [vmem:[#allocation11 + $0x58] sm:$0xf0]  ;;  %v3088_v56 = vld [vmem:[#allocation13 + $0xd4] sm:$0xf0]  ;;  %v2821_v57 = vld [vmem:[#allocation13 + $0x160] sm:$0xf] }
  0xcf   :  { %v578_v15 = vpop.f32.mrf.mxu2  ;;  %1357 = vmatpush.bf16.msra.mxu0 %v2614_v63  ;;  %v3038_v63 = vld [vmem:[#allocation11 + $0x4c] sm:$0xf] }
  0xd0   :  { %1064 = vmatmul.bf16.vlgmr.msra.gmra.mxu1 %v650_v10  ;;  %v591_v17 = vpop.f32.mrf.mxu3  ;;  %v2562_v2 = vor.u32 %v3038_v63, %v2559_v0  ;;  %v3122_v63 = vld [vmem:[#allocation13 + $0x1e4] sm:$0xf0] }
  0xd1   :  { %1369 = vmatpush.bf16.msra.mxu1 %v2634_v54  ;;  %v3050_v17 = vld [vmem:[#allocation11 + $0xac] sm:$0xf]  ;;  %v2550_v54 = vor.u32 %v3039_v51, %v2549_v50  ;;  %v2894_v51 = vor.u32 %v3124_v47, %v2893_v46  ;;  %v3098_v46 = vld [vmem:[#allocation13 + $0x124] sm:$0xf0]  ;;  %v2853_v47 = vld [vmem:[#allocation13 + $0x1a0] sm:$0xf] }
  0xd2   :  { %v2610_v21 = vor.u32 %v3050_v17, %v2607_v18  ;;  %v2519_v17 = vld [vmem:[#allocation11 + $0x10] sm:$0xf0]  ;;  %v2525_v18 = vld [vmem:[#allocation11 + $0x8] sm:$0xf] }
  0xd3   :  { %1358 = vmatpush.bf16.msra.mxu0 %v2598_v11  ;;  %v2543_v11 = vld [vmem:[#allocation11 + $0x38] sm:$0xf0] }
  0xd5   :  { %1370 = vmatpush.bf16.msra.mxu1 %v2618_v3  ;;  %v3035_v3 = vld [vmem:[#allocation11 + $0x2c] sm:$0xf0] }
  0xd6   :  { %v2534_v6 = vor.u32 %v3035_v3, %v2533_v1  ;;  %v3070_v3 = vld [vmem:[#allocation13 + $0x44] sm:$0xf0] }
  0xd8   :  { %1103 = vmatmul.bf16.vlgmr.msrb.gmra.mxu0 %v649_v52 }
  0xdf   :  { %v602_v27 = vpop.f32.mrf.mxu0 }
  0xe0   :  { %v603_v28 = vadd.f32 %v602_v27, %v215_v26  ;;  %v615_v29 = vpop.f32.mrf.mxu1  ;;  %1116 = vmatmul.bf16.vlgmr.msrb.gmra.mxu1 %v650_v10  ;;  %v3049_v10 = vld [vmem:[#allocation11 + $0xa4] sm:$0xf]  ;;  %v2582_v26 = vor.u32 %v3047_v24, %v2581_v23  ;;  %v2583_v27 = vld [vmem:[#allocation11 + $0x90] sm:$0xf0]  ;;  %v3030_v23 = vld [vmem:[#allocation11 + $0xc] sm:$0xf] }
  0xe1   :  { %v2602_v15 = vor.u32 %v3049_v10, %v2599_v12  ;;  %v3034_v10 = vld [vmem:[#allocation11 + $0x2c] sm:$0xf]  ;;  %v2517_v12 = vld [vmem:[#allocation11] sm:$0xf]  ;;  %v2527_v24 = vld [vmem:[#allocation11 + $0x18] sm:$0xf0] }
  0xe2   :  { %v616_v30 = vadd.f32 %v615_v29, %v603_v28  ;;  %v2589_v28 = vld [vmem:[#allocation11 + $0x88] sm:$0xf]  ;;  %v3048_v29 = vld [vmem:[#allocation11 + $0x94] sm:$0xf0]  ;;  %1359 = vmatpush.bf16.msra.mxu0 %v2582_v26 }
  0xe3   :  { %1371 = vmatpush.bf16.msra.mxu1 %v2602_v15  ;;  %v2546_v15 = vor.u32 %v3034_v10, %v2543_v11  ;;  %v3086_v10 = vld [vmem:[#allocation13 + $0xc4] sm:$0xf0] }
  0xe4   :  { %v647_v32 = vmax.f32 %v616_v30, 0.0  ;;  %v2586_v30 = vor.u32 %v3045_v25, %v2583_v27 }
  0xe6   :  { %v651_v33 = vpack.c.bf16 %v647_v32, %v647_v32  ;;  %v3046_v32 = vld [vmem:[#allocation11 + $0x8c] sm:$0xf] }
  0xe7   :  { %v628_v34 = vpop.f32.mrf.mxu2  ;;  %v604_v36 = vpop.f32.mrf.mxu0  ;;  %1372 = vmatpush.bf16.msra.mxu1 %v2586_v30 }
  0xe8   :  { %v629_v35 = vadd.f32 %v628_v34, %v216_v31  ;;  %v641_v49 = vpop.f32.mrf.mxu3  ;;  %v617_v37 = vpop.f32.mrf.mxu1  ;;  %1077 = vmatmul.bf16.vlgmr.msra.gmra.mxu2 %v651_v33  ;;  %v2590_v31 = vor.u32 %v3048_v29, %v2589_v28  ;;  %v3530_v34 = vld [vmem:[%s3562_s5] sm:$0x3]  ;;  %v3043_v36 = vld [vmem:[#allocation11 + $0x6c] sm:$0xf0]  ;;  %v2530_v29 = vor.u32 %v3030_v23, %v2527_v24  ;;  %v3068_v24 = vld [vmem:[#allocation13 + $0x34] sm:$0xf0] }
  0xe9   :  { %1382 = vmatpush.bf16.msra.mxu2 %v2638_v55  ;;  %v3041_v37 = vld [vmem:[#allocation11 + $0x64] sm:$0xf]  ;;  %v2551_v55 = vld [vmem:[#allocation11 + $0x50] sm:$0xf0]  ;;  %v2669_v23 = vld [vmem:[#allocation13 + $0x30] sm:$0xf] }
  0xea   :  { %v642_v38 = vadd.f32 %v641_v49, %v629_v35  ;;  %v2565_v49 = vld [vmem:[#allocation11 + $0x60] sm:$0xf] }
  0xec   :  { %v648_v53 = vmax.f32 %v642_v38, 0.0  ;;  %v2566_v38 = vor.u32 %v3043_v36, %v2565_v49  ;;  %v3092_v36 = vld [vmem:[#allocation13 + $0xf4] sm:$0xf0] }
  0xed   :  { %1383 = vmatpush.bf16.msra.mxu2 %v2622_v4  ;;  %v3033_v4 = vld [vmem:[#allocation11 + $0x24] sm:$0xf] }
  0xee   :  { %v652_v39 = vpack.c.bf16 %v648_v53, %v648_v53  ;;  %v2567_v53 = vld [vmem:[#allocation11 + $0x70] sm:$0xf0]  ;;  %1360 = vmatpush.bf16.msra.mxu0 %v2566_v38  ;;  %v3074_v38 = vld [vmem:[#allocation13 + $0x64] sm:$0xf0] }
  0xef   :  { %v630_v40 = vpop.f32.mrf.mxu2  ;;  %v2570_v44 = vor.u32 %v3041_v37, %v2567_v53  ;;  %v2693_v37 = vld [vmem:[#allocation13 + $0x60] sm:$0xf] }
  0xf0   :  { %v643_v41 = vpop.f32.mrf.mxu3  ;;  %1090 = vmatmul.bf16.vlgmr.msra.gmra.mxu3 %v652_v39  ;;  %v3044_v40 = vld [vmem:[#allocation11 + $0x74] sm:$0xf0] }
  0xf1   :  { %1395 = vmatpush.bf16.msra.mxu3 %v2642_v59  ;;  %1384 = vmatpush.bf16.msra.mxu2 %v2606_v16  ;;  %v719_v41 = vperm.slane %v3530_v34, 0  ;;  %v3029_v16 = vld [vmem:[#allocation11 + $0x4] sm:$0xf] }
  0xf2   :  { %1373 = vmatpush.bf16.msra.mxu1 %v2570_v44  ;;  %1361 = vmatpush.bf16.msra.mxu0 %v2550_v54  ;;  %v2522_v26 = vor.u32 %v3029_v16, %v2519_v17  ;;  %v2694_v44 = vor.u32 %v3074_v38, %v2693_v37  ;;  %v3072_v54 = vld [vmem:[#allocation13 + $0x54] sm:$0xf0]  ;;  %v3102_v16 = vld [vmem:[#allocation13 + $0x144] sm:$0xf0]  ;;  %v2869_v17 = vld [vmem:[#allocation13 + $0x1c0] sm:$0xf] }
  0xf3   :  { %v2661_v37 = vld [vmem:[#allocation13 + $0x20] sm:$0xf]  ;;  %v3066_v38 = vld [vmem:[#allocation13 + $0x24] sm:$0xf0] }
  0xf5   :  { %1396 = vmatpush.bf16.msra.mxu3 %v2626_v7  ;;  %1385 = vmatpush.bf16.msra.mxu2 %v2590_v31  ;;  %v2538_v7 = vor.u32 %v3033_v4, %v2535_v5  ;;  %v720_v31 = vperm.slane %v3530_v34, 1 }
  0xf6   :  { %1362 = vmatpush.bf16.msra.mxu0 %v2534_v6  ;;  %v2813_v6 = vld [vmem:[#allocation13 + $0x150] sm:$0xf] }
  0xf8   :  { %1129 = vmatmul.bf16.vlgmr.msrb.gmra.mxu2 %v651_v33  ;;  %v2591_v33 = vld [vmem:[#allocation11 + $0x98] sm:$0xf0] }
  0xf9   :  { %1397 = vmatpush.bf16.msra.mxu3 %v2610_v21  ;;  %v2594_v35 = vor.u32 %v3046_v32, %v2591_v33  ;;  %v2518_v21 = vor.u32 %v3031_v13, %v2517_v12  ;;  %v2701_v32 = vld [vmem:[#allocation13 + $0x70] sm:$0xf]  ;;  %v3076_v33 = vld [vmem:[#allocation13 + $0x74] sm:$0xf0]  ;;  %v2805_v13 = vld [vmem:[#allocation13 + $0x140] sm:$0xf] }
  0xfa   :  { %v2702_v49 = vor.u32 %v3076_v33, %v2701_v32  ;;  %v3100_v32 = vld [vmem:[#allocation13 + $0x134] sm:$0xf0]  ;;  %v2861_v33 = vld [vmem:[#allocation13 + $0x1b0] sm:$0xf] }
  0xfb   :  { %1363 = vmatpush.bf16.msra.mxu0 %v2518_v21 }
  0xfd   :  { %1398 = vmatpush.bf16.msra.mxu3 %v2594_v35  ;;  %v2765_v35 = vld [vmem:[#allocation13 + $0xf0] sm:$0xf] }
  0xfe   :  { %v2766_v53 = vor.u32 %v3092_v36, %v2765_v35  ;;  %v3116_v35 = vld [vmem:[#allocation13 + $0x1b4] sm:$0xf0] }
  0xff   :  { %1806 = vmatpush.bf16.msrb.mxu0 %v2702_v49 }
 0x100   :  { %1142 = vmatmul.bf16.vlgmr.msrb.gmra.mxu3 %v652_v39  ;;  %v2573_v39 = vld [vmem:[#allocation11 + $0x68] sm:$0xf] }
 0x101   :  { %v2574_v45 = vor.u32 %v3044_v40, %v2573_v39  ;;  %1399 = vmatpush.bf16.msra.mxu3 %v2578_v48  ;;  %v2757_v39 = vld [vmem:[#allocation13 + $0xe0] sm:$0xf]  ;;  %v3090_v40 = vld [vmem:[#allocation13 + $0xe4] sm:$0xf0] }
 0x102   :  { %v2758_v34 = vor.u32 %v3090_v40, %v2757_v39  ;;  %v3082_v39 = vld [vmem:[#allocation13 + $0xa4] sm:$0xf0] }
 0x103   :  { %1386 = vmatpush.bf16.msra.mxu2 %v2574_v45  ;;  %v3108_v45 = vld [vmem:[#allocation13 + $0x174] sm:$0xf0]  ;;  %1807 = vmatpush.bf16.msrb.mxu0 %v2694_v44 }
 0x105   :  { %1400 = vmatpush.bf16.msra.mxu3 %v2562_v2  ;;  %v2677_v2 = vld [vmem:[#allocation13 + $0x40] sm:$0xf] }
 0x107   :  { %1387 = vmatpush.bf16.msra.mxu2 %v2558_v62  ;;  %v2885_v62 = vld [vmem:[#allocation13 + $0x1e0] sm:$0xf] }
 0x108   :  { %v2886_v1 = vor.u32 %v3122_v63, %v2885_v62  ;;  %v2845_v62 = vld [vmem:[#allocation13 + $0x190] sm:$0xf]  ;;  %v3112_v63 = vld [vmem:[#allocation13 + $0x194] sm:$0xf0] }
 0x109   :  { %1401 = vmatpush.bf16.msra.mxu3 %v2546_v15  ;;  %v2678_v15 = vor.u32 %v3070_v3, %v2677_v2  ;;  %v2645_v2 = vld [vmem:[#allocation13] sm:$0xf] }
 0x10d   :  { %1402 = vmatpush.bf16.msra.mxu3 %v2530_v29 }
 0x111   :  { %1845 = vmatpush.bf16.msrb.mxu3 %v2894_v51  ;;  %v3064_v51 = vld [vmem:[#allocation13 + $0x14] sm:$0xf0] }
 0x115   :  { %1846 = vmatpush.bf16.msrb.mxu3 %v2886_v1 }
 0x145   :  { %v3519_v42 = vpop.f32.mrf.mxu0 }
 0x146   :  { %v1053_v59 = vadd.f32 %v3519_v42, %v719_v41  ;;  %v2542_v42 = vor.u32 %v3036_v9, %v2541_v8  ;;  %v2829_v41 = vld [vmem:[#allocation13 + $0x170] sm:$0xf]  ;;  %v2741_v9 = vld [vmem:[#allocation13 + $0xc0] sm:$0xf] }
 0x147   :  { %v2830_v50 = vor.u32 %v3108_v45, %v2829_v41  ;;  %v2877_v8 = vld [vmem:[#allocation13 + $0x1d0] sm:$0xf]  ;;  %v2862_v41 = vor.u32 %v3116_v35, %v2861_v33  ;;  %v2662_v45 = vor.u32 %v3066_v38, %v2661_v37  ;;  %v3087_v37 = vld [vmem:[#allocation13 + $0xd4] sm:$0xf] }
 0x148   :  { %1388 = vmatpush.bf16.msra.mxu2 %v2542_v42 }
 0x14d   :  { %v3521_v43 = vpop.f32.mrf.mxu1  ;;  %v1054_v19 = vpop.f32.mrf.mxu0 }
 0x14e   :  { %v1066_v14 = vadd.f32 %v3521_v43, %v1053_v59  ;;  %v3106_v59 = vld [vmem:[#allocation13 + $0x164] sm:$0xf0] }
 0x155   :  { %v1067_v52 = vpop.f32.mrf.mxu1  ;;  %v3523_v58 = vpop.f32.mrf.mxu0 }
 0x156   :  { %v3037_v52 = vld [vmem:[#allocation11 + $0x44] sm:$0xf] }
 0x157   :  { %v2554_v61 = vor.u32 %v3037_v52, %v2551_v55  ;;  %v2685_v52 = vld [vmem:[#allocation13 + $0x50] sm:$0xf] }
 0x158   :  { %v2749_v55 = vld [vmem:[#allocation13 + $0xd0] sm:$0xf]  ;;  %v2686_v0 = vor.u32 %v3072_v54, %v2685_v52  ;;  %v3080_v54 = vld [vmem:[#allocation13 + $0x94] sm:$0xf0] }
 0x159   :  { %1374 = vmatpush.bf16.msra.mxu1 %v2554_v61  ;;  %v2822_v61 = vor.u32 %v3106_v59, %v2821_v57  ;;  %v2750_v5 = vor.u32 %v3088_v56, %v2749_v55  ;;  %v2717_v52 = vld [vmem:[#allocation13 + $0x90] sm:$0xf]  ;;  %v1147_v55 = vld [vmem:[#allocation5] sm:$0xff] }
 0x15a   :  { %1808 = vmatpush.bf16.msrb.mxu0 %v2686_v0  ;;  %v2781_v59 = vld [vmem:[#allocation13 + $0x110] sm:$0xf]  ;;  %v2718_v1 = vor.u32 %v3080_v54, %v2717_v52  ;;  %v3103_v54 = vld [vmem:[#allocation13 + $0x154] sm:$0xf] }
 0x15d   :  { %v3525_v20 = vpop.f32.mrf.mxu1  ;;  %v1106_v22 = vpop.f32.mrf.mxu0  ;;  %1375 = vmatpush.bf16.msra.mxu1 %v2538_v7  ;;  %v3104_v7 = vld [vmem:[#allocation13 + $0x154] sm:$0xf0] }
 0x15e   :  { %v3032_v22 = vld [vmem:[#allocation11 + $0x14] sm:$0xf0]  ;;  %v2814_v11 = vor.u32 %v3104_v7, %v2813_v6  ;;  %1809 = vmatpush.bf16.msrb.mxu0 %v2678_v15  ;;  %v3078_v6 = vld [vmem:[#allocation13 + $0x84] sm:$0xf0]  ;;  %v3075_v7 = vld [vmem:[#allocation13 + $0x74] sm:$0xf] }
 0x15f   :  { %v2526_v27 = vor.u32 %v3032_v22, %v2525_v18  ;;  %v2742_v22 = vor.u32 %v3086_v10, %v2741_v9  ;;  %v3091_v9 = vld [vmem:[#allocation13 + $0xf4] sm:$0xf]  ;;  %v3110_v15 = vld [vmem:[#allocation13 + $0x184] sm:$0xf0] }
 0x161   :  { %1376 = vmatpush.bf16.msra.mxu1 %v2522_v26  ;;  %1389 = vmatpush.bf16.msra.mxu2 %v2526_v27  ;;  %v3084_v26 = vld [vmem:[#allocation13 + $0xb4] sm:$0xf0] }
 0x165   :  { %v1119_v19 = vpop.f32.mrf.mxu1  ;;  %1819 = vmatpush.bf16.msrb.mxu1 %v2766_v53  ;;  %1832 = vmatpush.bf16.msrb.mxu2 %v2830_v50  ;;  %v2725_v53 = vld [vmem:[#allocation13 + $0xa0] sm:$0xf]  ;;  %v2653_v50 = vld [vmem:[#allocation13 + $0x10] sm:$0xf] }
 0x169   :  { %1820 = vmatpush.bf16.msrb.mxu1 %v2758_v34  ;;  %1833 = vmatpush.bf16.msrb.mxu2 %v2822_v61  ;;  %v2726_v34 = vor.u32 %v3082_v39, %v2725_v53  ;;  %v3096_v61 = vld [vmem:[#allocation13 + $0x114] sm:$0xf0]  ;;  %v2751_v53 = vld [vmem:[#allocation13 + $0xd8] sm:$0xf0] }
 0x16a   :  { %v2782_v10 = vor.u32 %v3096_v61, %v2781_v59  ;;  %v2754_v39 = vor.u32 %v3087_v37, %v2751_v53  ;;  %v2879_v59 = vld [vmem:[#allocation13 + $0x1d8] sm:$0xf0]  ;;  %v3067_v61 = vld [vmem:[#allocation13 + $0x34] sm:$0xf] }
 0x16b   :  { %v1078_v60 = vpop.f32.mrf.mxu2  ;;  %v3095_v37 = vld [vmem:[#allocation13 + $0x114] sm:$0xf] }
 0x16c   :  { %v1079_v25 = vadd.f32 %v1078_v60, %v1066_v14  ;;  %v1105_v60 = vadd.f32 %v3523_v58, %v720_v31  ;;  %v3120_v58 = vld [vmem:[#allocation13 + $0x1d4] sm:$0xf0]  ;;  %v2670_v31 = vor.u32 %v3068_v24, %v2669_v23  ;;  %v2895_v23 = vld [vmem:[#allocation13 + $0x1f8] sm:$0xf0]  ;;  %v3111_v53 = vld [vmem:[#allocation13 + $0x194] sm:$0xf] }
 0x16d   :  { %v2878_v12 = vor.u32 %v3120_v58, %v2877_v8  ;;  %1821 = vmatpush.bf16.msrb.mxu1 %v2750_v5  ;;  %1834 = vmatpush.bf16.msrb.mxu2 %v2814_v11  ;;  %v2709_v5 = vld [vmem:[#allocation13 + $0x80] sm:$0xf]  ;;  %v2703_v8 = vld [vmem:[#allocation13 + $0x78] sm:$0xf0]  ;;  %v2846_v58 = vor.u32 %v3112_v63, %v2845_v62 }
 0x16e   :  { %v1118_v4 = vadd.f32 %v3525_v20, %v1105_v60  ;;  %v3118_v20 = vld [vmem:[#allocation13 + $0x1c4] sm:$0xf0]  ;;  %1810 = vmatpush.bf16.msrb.mxu0 %v2670_v31  ;;  %v2654_v60 = vor.u32 %v3064_v51, %v2653_v50  ;;  %v2767_v11 = vld [vmem:[#allocation13 + $0xf8] sm:$0xf0]  ;;  %v2706_v24 = vor.u32 %v3075_v7, %v2703_v8  ;;  %v2743_v51 = vld [vmem:[#allocation13 + $0xc8] sm:$0xf0] }
 0x16f   :  { %1847 = vmatpush.bf16.msrb.mxu3 %v2878_v12  ;;  %v2870_v29 = vor.u32 %v3118_v20, %v2869_v17  ;;  %v2773_v12 = vld [vmem:[#allocation13 + $0x100] sm:$0xf]  ;;  %v2671_v62 = vld [vmem:[#allocation13 + $0x38] sm:$0xf0]  ;;  %v2871_v7 = vld [vmem:[#allocation13 + $0x1c8] sm:$0xf0] }
 0x170   :  { %v2674_v63 = vor.u32 %v3067_v61, %v2671_v62 }
 0x171   :  { %1822 = vmatpush.bf16.msrb.mxu1 %v2742_v22  ;;  %v3123_v22 = vld [vmem:[#allocation13 + $0x1f4] sm:$0xf] }
 0x172   :  { %1811 = vmatpush.bf16.msrb.mxu0 %v2662_v45  ;;  %v2887_v45 = vld [vmem:[#allocation13 + $0x1e8] sm:$0xf0] }
 0x173   :  { %v1091_v28 = vpop.f32.mrf.mxu3  ;;  %v1080_v43 = vpop.f32.mrf.mxu2  ;;  %1848 = vmatpush.bf16.msrb.mxu3 %v2870_v29 }
 0x174   :  { %v3535_v30 = vadd.f32 %v1091_v28, %v1079_v25  ;;  %v2733_v25 = vld [vmem:[#allocation13 + $0xb0] sm:$0xf]  ;;  %v2806_v28 = vor.u32 %v3102_v16, %v2805_v13  ;;  %v3094_v13 = vld [vmem:[#allocation13 + $0x104] sm:$0xf0]  ;;  %v3107_v16 = vld [vmem:[#allocation13 + $0x174] sm:$0xf] }
 0x175   :  { %v2797_v43 = vld [vmem:[#allocation13 + $0x130] sm:$0xf]  ;;  %v2734_v36 = vor.u32 %v3084_v26, %v2733_v25  ;;  %v2770_v25 = vor.u32 %v3091_v9, %v2767_v11  ;;  %v3073_v26 = vld [vmem:[#allocation13 + $0x64] sm:$0xf]  ;;  %v2774_v29 = vor.u32 %v3094_v13, %v2773_v12  ;;  %v2727_v11 = vld [vmem:[#allocation13 + $0xa8] sm:$0xf0] }
 0x176   :  { %1950 = vst [vmem:[#allocation15] sm:$0xff] %v3535_v30  ;;  %1835 = vmatpush.bf16.msrb.mxu2 %v2806_v28  ;;  %v2798_v40 = vor.u32 %v3100_v32, %v2797_v43  ;;  %1812 = vmatpush.bf16.msrb.mxu0 %v2654_v60  ;;  %v2759_v28 = vld [vmem:[#allocation13 + $0xe8] sm:$0xf0]  ;;  %v2898_v32 = vor.u32 %v3123_v22, %v2895_v23  ;;  %v3065_v9 = vld [vmem:[#allocation13 + $0x24] sm:$0xf] }
 0x177   :  { %1823 = vmatpush.bf16.msrb.mxu1 %v2734_v36  ;;  %1849 = vmatpush.bf16.msrb.mxu3 %v2862_v41  ;;  %v2687_v36 = vld [vmem:[#allocation13 + $0x58] sm:$0xf0]  ;;  %v2823_v41 = vld [vmem:[#allocation13 + $0x168] sm:$0xf0]  ;;  %v3099_v13 = vld [vmem:[#allocation13 + $0x134] sm:$0xf] }
 0x178   :  { %v3079_v22 = vld [vmem:[#allocation13 + $0x94] sm:$0xf]  ;;  %1973 = dma.vmem_to_hbm [thread:$0]  %s1969_s21, 128, %s1971_s20, [#allocation16]  }
 0x17a   :  { %1836 = vmatpush.bf16.msrb.mxu2 %v2798_v40  ;;  %v3105_v40 = vld [vmem:[#allocation13 + $0x164] sm:$0xf] }
 0x17b   :  { %v1093_v19 = vpop.f32.mrf.mxu3  ;;  %v1130_v48 = vpop.f32.mrf.mxu2  ;;  %1824 = vmatpush.bf16.msrb.mxu1 %v2726_v34  ;;  %v3085_v34 = vld [vmem:[#allocation13 + $0xc4] sm:$0xf] }
 0x17c   :  { %v1131_v42 = vadd.f32 %v1130_v48, %v1118_v4  ;;  %v2789_v19 = vld [vmem:[#allocation13 + $0x120] sm:$0xf]  ;;  %v3114_v48 = vld [vmem:[#allocation13 + $0x1a4] sm:$0xf0]  ;;  %v2746_v52 = vor.u32 %v3085_v34, %v2743_v51  ;;  %v1186_v34 = vld [vmem:[%s3564_s7] sm:$0xf] }
 0x17d   :  { %v2790_v56 = vor.u32 %v3098_v46, %v2789_v19  ;;  %v2854_v57 = vor.u32 %v3114_v48, %v2853_v47  ;;  %v3062_v4 = vld [vmem:[#allocation13 + $0x4] sm:$0xf0]  ;;  %v2826_v19 = vor.u32 %v3105_v40, %v2823_v41  ;;  %v3069_v47 = vld [vmem:[#allocation13 + $0x44] sm:$0xf]  ;;  %v2679_v48 = vld [vmem:[#allocation13 + $0x48] sm:$0xf0] }
 0x17e   :  { %v2646_v20 = vor.u32 %v3062_v4, %v2645_v2  ;;  %v2682_v50 = vor.u32 %v3069_v47, %v2679_v48  ;;  %v2807_v4 = vld [vmem:[#allocation13 + $0x148] sm:$0xf0]  ;;  %v2847_v40 = vld [vmem:[#allocation13 + $0x198] sm:$0xf0]  ;;  %v1189_v51 = vperm.slane %v1186_v34, 1  ;;  %v1191_v61 = vperm.slane %v1186_v34, 3 }
 0x17f   :  { %1837 = vmatpush.bf16.msrb.mxu2 %v2790_v56  ;;  %1850 = vmatpush.bf16.msrb.mxu3 %v2854_v57  ;;  %v3119_v56 = vld [vmem:[#allocation13 + $0x1d4] sm:$0xf]  ;;  %v2850_v41 = vor.u32 %v3111_v53, %v2847_v40  ;;  %v2839_v47 = vld [vmem:[#allocation13 + $0x188] sm:$0xf0] }
 0x180   :  { %1825 = vmatpush.bf16.msrb.mxu1 %v2718_v1  ;;  %1813 = vmatpush.bf16.msrb.mxu0 %v2646_v20  ;;  %v2882_v60 = vor.u32 %v3119_v56, %v2879_v59  ;;  %v2735_v1 = vld [vmem:[#allocation13 + $0xb8] sm:$0xf0] }
 0x183   :  { %v1143_v14 = vpop.f32.mrf.mxu3  ;;  %v1132_v21 = vpop.f32.mrf.mxu2  ;;  %1838 = vmatpush.bf16.msrb.mxu2 %v2782_v10  ;;  %1851 = vmatpush.bf16.msrb.mxu3 %v2846_v58  ;;  %v2663_v10 = vld [vmem:[#allocation13 + $0x28] sm:$0xf0]  ;;  %v3081_v58 = vld [vmem:[#allocation13 + $0xa4] sm:$0xf] }
 0x184   :  { %v1144_v18 = vadd.f32 %v1143_v14, %v1131_v42  ;;  %v2837_v14 = vld [vmem:[#allocation13 + $0x180] sm:$0xf]  ;;  %v2831_v21 = vld [vmem:[#allocation13 + $0x178] sm:$0xf0]  ;;  %v2730_v12 = vor.u32 %v3081_v58, %v2727_v11 }
 0x185   :  { %v2838_v43 = vor.u32 %v3110_v15, %v2837_v14  ;;  %v2834_v31 = vor.u32 %v3107_v16, %v2831_v21  ;;  %v2799_v14 = vld [vmem:[#allocation13 + $0x138] sm:$0xf0]  ;;  %v3115_v15 = vld [vmem:[#allocation13 + $0x1b4] sm:$0xf] }
 0x186   :  { %v1148_v27 = vmul.f32 0.5, %v1144_v18  ;;  %1951 = vst [vmem:[#allocation17] sm:$0xff] %v1144_v18  ;;  %v2710_v18 = vor.u32 %v3078_v6, %v2709_v5  ;;  %v3117_v5 = vld [vmem:[#allocation13 + $0x1c4] sm:$0xf]  ;;  %v2802_v16 = vor.u32 %v3099_v13, %v2799_v14  ;;  %v2655_v21 = vld [vmem:[#allocation13 + $0x18] sm:$0xf0] }
 0x187   :  { %1839 = vmatpush.bf16.msrb.mxu2 %v2774_v29  ;;  %1852 = vmatpush.bf16.msrb.mxu3 %v2838_v43  ;;  %v2874_v8 = vor.u32 %v3117_v5, %v2871_v7  ;;  %v2855_v29 = vld [vmem:[#allocation13 + $0x1a8] sm:$0xf0]  ;;  %v3061_v43 = vld [vmem:[#allocation13 + $0x4] sm:$0xf]  ;;  %1984 = dma.vmem_to_hbm [thread:$0]  %s1980_s23, 128, %s1982_s6, [#allocation16]  }
 0x188   :  { %v1149_v49 = vmul.f32 1.442695, %v1148_v27  ;;  %v3089_v27 = vld [vmem:[#allocation13 + $0xe4] sm:$0xf]  ;;  %1826 = vmatpush.bf16.msrb.mxu1 %v2710_v18  ;;  %v3063_v18 = vld [vmem:[#allocation13 + $0x14] sm:$0xf] }
 0x189   :  { %v2762_v35 = vor.u32 %v3089_v27, %v2759_v28  ;;  %v2658_v23 = vor.u32 %v3063_v18, %v2655_v21  ;;  %v3113_v28 = vld [vmem:[#allocation13 + $0x1a4] sm:$0xf] }
 0x18a   :  { %3139 = vpow2.f32 %v1149_v49  ;;  %v3071_v49 = vld [vmem:[#allocation13 + $0x54] sm:$0xf] }
 0x18b   :  { %v1145_v44 = vpop.f32.mrf.mxu3  ;;  %v2690_v38 = vor.u32 %v3071_v49, %v2687_v36 }
 0x18c   :  { %v3121_v44 = vld [vmem:[#allocation13 + $0x1e4] sm:$0xf] }
 0x18d   :  { %v2890_v46 = vor.u32 %v3121_v44, %v2887_v45  ;;  %v2775_v44 = vld [vmem:[#allocation13 + $0x108] sm:$0xf0]  ;;  %v3109_v45 = vld [vmem:[#allocation13 + $0x184] sm:$0xf] }
 0x18e   :  { %v2842_v48 = vor.u32 %v3109_v45, %v2839_v47 }
 0x190   :  { %v3140_v0 = vpop.eup %3139 }
 0x191   :  { %v1151_v3 = vmul.f32 %v3140_v0, %v1147_v55  ;;  %v2815_v55 = vld [vmem:[#allocation13 + $0x158] sm:$0xf0]  ;;  %v3083_v0 = vld [vmem:[#allocation13 + $0xb4] sm:$0xf] }
 0x192   :  { %v2818_v57 = vor.u32 %v3103_v54, %v2815_v55  ;;  %v2738_v2 = vor.u32 %v3083_v0, %v2735_v1 }
 0x193   :  { %v1152_v42 = vadd.f32 %v1151_v3, %v3535_v30  ;;  %v2695_v30 = vld [vmem:[#allocation13 + $0x68] sm:$0xf0]  ;;  %v3101_v3 = vld [vmem:[#allocation13 + $0x144] sm:$0xf] }
 0x194   :  { %v2698_v33 = vor.u32 %v3073_v26, %v2695_v30  ;;  %v2810_v6 = vor.u32 %v3101_v3, %v2807_v4  ;;  %v2791_v26 = vld [vmem:[#allocation13 + $0x128] sm:$0xf0] }
 0x195   :  { %v1153_v17 = vpack.c.bf16 %v1152_v42, %v1152_v42  ;;  %v2666_v42 = vor.u32 %v3065_v9, %v2663_v10 }
 0x197   :  { %1364 = vmatmul.bf16.vlgmr.msra.gmra.mxu0 %v1153_v17  ;;  %1377 = vmatmul.bf16.vlgmr.msra.gmra.mxu1 %v1153_v17 }
 0x198   :  { %1390 = vmatmul.bf16.vlgmr.msra.gmra.mxu2 %v1153_v17  ;;  %1403 = vmatmul.bf16.vlgmr.msra.gmra.mxu3 %v1153_v17  ;;  %v2863_v17 = vld [vmem:[#allocation13 + $0x1b8] sm:$0xf0] }
 0x199   :  { %1858 = vmatpush.bf16.msra.mxu0 %v2706_v24  ;;  %1871 = vmatpush.bf16.msra.mxu1 %v2770_v25  ;;  %v2866_v20 = vor.u32 %v3115_v15, %v2863_v17  ;;  %v2719_v24 = vld [vmem:[#allocation13 + $0x98] sm:$0xf0]  ;;  %v3097_v25 = vld [vmem:[#allocation13 + $0x124] sm:$0xf] }
 0x19a   :  { %1884 = vmatpush.bf16.msra.mxu2 %v2834_v31  ;;  %1897 = vmatpush.bf16.msra.mxu3 %v2898_v32  ;;  %v2722_v30 = vor.u32 %v3079_v22, %v2719_v24  ;;  %v2794_v27 = vor.u32 %v3097_v25, %v2791_v26  ;;  %v2858_v31 = vor.u32 %v3113_v28, %v2855_v29  ;;  %v2647_v32 = vld [vmem:[#allocation13 + $0x8] sm:$0xf0] }
 0x19b   :  { %v2650_v49 = vor.u32 %v3061_v43, %v2647_v32 }
 0x19d   :  { %1859 = vmatpush.bf16.msra.mxu0 %v2698_v33  ;;  %1872 = vmatpush.bf16.msra.mxu1 %v2762_v35  ;;  %v3077_v33 = vld [vmem:[#allocation13 + $0x84] sm:$0xf]  ;;  %v2711_v35 = vld [vmem:[#allocation13 + $0x88] sm:$0xf0] }
 0x19e   :  { %1885 = vmatpush.bf16.msra.mxu2 %v2826_v19  ;;  %1898 = vmatpush.bf16.msra.mxu3 %v2890_v46  ;;  %v2714_v36 = vor.u32 %v3077_v33, %v2711_v35  ;;  %v3093_v19 = vld [vmem:[#allocation13 + $0x104] sm:$0xf] }
 0x19f   :  { %v2778_v46 = vor.u32 %v3093_v19, %v2775_v44 }
 0x1a1   :  { %1860 = vmatpush.bf16.msra.mxu0 %v2690_v38  ;;  %1873 = vmatpush.bf16.msra.mxu1 %v2754_v39  ;;  %v2783_v38 = vld [vmem:[#allocation13 + $0x118] sm:$0xf0] }
 0x1a2   :  { %1886 = vmatpush.bf16.msra.mxu2 %v2818_v57  ;;  %1899 = vmatpush.bf16.msra.mxu3 %v2882_v60  ;;  %v2786_v39 = vor.u32 %v3095_v37, %v2783_v38  ;;  %v1190_v60 = vperm.slane %v1186_v34, 2 }
 0x1a5   :  { %1861 = vmatpush.bf16.msra.mxu0 %v2682_v50  ;;  %1874 = vmatpush.bf16.msra.mxu1 %v2746_v52  ;;  %v1188_v50 = vperm.slane %v1186_v34, 0 }
 0x1a6   :  { %1887 = vmatpush.bf16.msra.mxu2 %v2810_v6  ;;  %1900 = vmatpush.bf16.msra.mxu3 %v2874_v8 }
 0x1a9   :  { %1862 = vmatpush.bf16.msra.mxu0 %v2674_v63  ;;  %1875 = vmatpush.bf16.msra.mxu1 %v2738_v2 }
 0x1aa   :  { %1888 = vmatpush.bf16.msra.mxu2 %v2802_v16  ;;  %1901 = vmatpush.bf16.msra.mxu3 %v2866_v20 }
 0x1ad   :  { %1863 = vmatpush.bf16.msra.mxu0 %v2666_v42  ;;  %1876 = vmatpush.bf16.msra.mxu1 %v2730_v12  ;;  %v1480_v12 = vld [vmem:[%s3566_s9] sm:$0x3]  ;;  %s3414_s9 = smov [#allocation14]  }
 0x1ae   :  { %1889 = vmatpush.bf16.msra.mxu2 %v2794_v27  ;;  %1902 = vmatpush.bf16.msra.mxu3 %v2858_v31  ;;  %v1482_v13 = vperm.slane %v1480_v12, 0  ;;  %v1483_v26 = vperm.slane %v1480_v12, 1  ;;  %s1957_s11 = sshll.u32 %s3414_s9, 4  ;;  %s1958_s11 = int_to_ptr.vmem [resolvable:$true] %s1957_s11 }
 0x1b1   :  { %1864 = vmatpush.bf16.msra.mxu0 %v2658_v23  ;;  %1877 = vmatpush.bf16.msra.mxu1 %v2722_v30 }
 0x1b2   :  { %1890 = vmatpush.bf16.msra.mxu2 %v2786_v39  ;;  %1903 = vmatpush.bf16.msra.mxu3 %v2850_v41 }
 0x1b5   :  { %1865 = vmatpush.bf16.msra.mxu0 %v2650_v49  ;;  %1878 = vmatpush.bf16.msra.mxu1 %v2714_v36 }
 0x1b6   :  { %1891 = vmatpush.bf16.msra.mxu2 %v2778_v46  ;;  %1904 = vmatpush.bf16.msra.mxu3 %v2842_v48 }
 0x214   :  { %v1365_v52 = vpop.f32.mrf.mxu0  ;;  %v1378_v54 = vpop.f32.mrf.mxu1 }
 0x215   :  { %v1366_v55 = vadd.f32 %v1365_v52, %v1188_v50  ;;  %v1379_v56 = vadd.f32 %v1378_v54, %v1189_v51 }
 0x217   :  { %v1408_v57 = vmax.f32 %v1366_v55, 0.0  ;;  %v1409_v59 = vmax.f32 %v1379_v56, 0.0 }
 0x219   :  { %v1412_v62 = vpack.c.bf16 %v1408_v57, %v1408_v57  ;;  %v1413_v63 = vpack.c.bf16 %v1409_v59, %v1409_v59 }
 0x21b   :  { %v1391_v0 = vpop.f32.mrf.mxu2  ;;  %v1404_v1 = vpop.f32.mrf.mxu3  ;;  %1814 = vmatmul.bf16.vlgmr.msrb.gmra.mxu0 %v1412_v62  ;;  %1827 = vmatmul.bf16.vlgmr.msrb.gmra.mxu1 %v1413_v63 }
 0x21c   :  { %v1392_v2 = vadd.f32 %v1391_v0, %v1190_v60  ;;  %v1405_v3 = vadd.f32 %v1404_v1, %v1191_v61  ;;  %v1367_v4 = vpop.f32.mrf.mxu0  ;;  %v1380_v5 = vpop.f32.mrf.mxu1 }
 0x21e   :  { %v1410_v6 = vmax.f32 %v1392_v2, 0.0  ;;  %v1411_v7 = vmax.f32 %v1405_v3, 0.0 }
 0x220   :  { %v1414_v8 = vpack.c.bf16 %v1410_v6, %v1410_v6  ;;  %v1415_v9 = vpack.c.bf16 %v1411_v7, %v1411_v7 }
 0x222   :  { %1840 = vmatmul.bf16.vlgmr.msrb.gmra.mxu2 %v1414_v8  ;;  %1853 = vmatmul.bf16.vlgmr.msrb.gmra.mxu3 %v1415_v9 }
 0x223   :  { %v1393_v10 = vpop.f32.mrf.mxu2  ;;  %v1406_v58 = vpop.f32.mrf.mxu3 }
 0x22b   :  { %1866 = vmatmul.bf16.vlgmr.msra.gmra.mxu0 %v1412_v62  ;;  %1879 = vmatmul.bf16.vlgmr.msra.gmra.mxu1 %v1413_v63 }
 0x232   :  { %1892 = vmatmul.bf16.vlgmr.msra.gmra.mxu2 %v1414_v8  ;;  %1905 = vmatmul.bf16.vlgmr.msra.gmra.mxu3 %v1415_v9 }
 0x298   :  { %v1815_v42 = vpop.f32.mrf.mxu0  ;;  %v1828_v11 = vpop.f32.mrf.mxu1 }
 0x299   :  { %v1816_v14 = vadd.f32 %v1815_v42, %v1482_v13 }
 0x29b   :  { %v1829_v17 = vadd.f32 %v1828_v11, %v1816_v14 }
 0x2a0   :  { %v1817_v15 = vpop.f32.mrf.mxu0  ;;  %v1830_v16 = vpop.f32.mrf.mxu1 }
 0x2a5   :  { %v1841_v20 = vpop.f32.mrf.mxu2  ;;  %v1854_v18 = vpop.f32.mrf.mxu3 }
 0x2a6   :  { %v1842_v21 = vadd.f32 %v1841_v20, %v1829_v17 }
 0x2a8   :  { %v1855_v22 = vadd.f32 %v1854_v18, %v1842_v21  ;;  %v1867_v23 = vpop.f32.mrf.mxu0  ;;  %v1880_v24 = vpop.f32.mrf.mxu1 }
 0x2a9   :  { %v1868_v28 = vadd.f32 %v1867_v23, %v1483_v26 }
 0x2aa   :  { %v2899_v25 = vmul.f32 -1.442695, %v1855_v22 }
 0x2ab   :  { %v1881_v33 = vadd.f32 %v1880_v24, %v1868_v28 }
 0x2ac   :  { %3141 = vpow2.f32 %v2899_v25 }
 0x2ad   :  { %v1843_v30 = vpop.f32.mrf.mxu2  ;;  %v1856_v27 = vpop.f32.mrf.mxu3 }
 0x2b0   :  { %v1869_v29 = vpop.f32.mrf.mxu0  ;;  %v1882_v43 = vpop.f32.mrf.mxu1 }
 0x2b2   :  { %v3142_v31 = vpop.eup %3141 }
 0x2b3   :  { %v1916_v32 = vadd.f32 1.0, %v3142_v31 }
 0x2b5   :  { %3143 = vrcp.f32 %v1916_v32  ;;  %v1893_v35 = vpop.f32.mrf.mxu2  ;;  %v1906_v49 = vpop.f32.mrf.mxu3  ;;  %v1929_v44 = vand.u32 2147483648, %v1916_v32  ;;  %v1927_v46 = vand.u32 2147483647, %v1916_v32  ;;  %vm1923_vm1 = vweird.f32 %v1916_v32 }
 0x2b6   :  { %v1894_v36 = vadd.f32 %v1893_v35, %v1881_v33 }
 0x2b7   :  { %v1930_v50 = vor.u32 1.1754944e-38, %v1929_v44  ;;  %vm1928_vm3 = vcmp.eq.f32.partialorder %v1927_v46, 8.507059e+37 }
 0x2b8   :  { %v1907_v37 = vadd.f32 %v1906_v49, %v1894_v36 }
 0x2ba   :  { %v2900_v38 = vmul.f32 -1.442695, %v1907_v37 }
 0x2bb   :  { %v3144_v53 = vpop.eup %3143 }
 0x2bc   :  { %v1919_v39 = vmul.f32 %v3144_v53, %v1916_v32  ;;  %3145 = vpow2.f32 %v2900_v38  ;;  %vm1924_vm0 = vweird.f32 %v3144_v53 }
 0x2bd   :  { %v1895_v40 = vpop.f32.mrf.mxu2  ;;  %v1908_v41 = vpop.f32.mrf.mxu3  ;;  %vm1925_vm2 = vmor %vm1923_vm1, %vm1924_vm0 }
 0x2be   :  { %v1920_v19 = vsub.f32 1.0, %v1919_v39 }
 0x2c0   :  { %v1921_v45 = vmul.f32 %v3144_v53, %v1920_v19 }
 0x2c2   :  { %v3146_v47 = vpop.eup %3145  ;;  %v1922_v48 = vadd.f32 %v3144_v53, %v1921_v45 }
 0x2c3   :  { %v1917_v34 = vadd.f32 1.0, %v3146_v47 }
 0x2c4   :  { %v1926_v51 = vsel %vm1925_vm2, %v3144_v53, %v1922_v48 }
 0x2c5   :  { %3147 = vrcp.f32 %v1917_v34  ;;  %v1931_v52 = vsel %vm1928_vm3, %v1930_v50, %v1926_v51  ;;  %v1944_v57 = vand.u32 2147483648, %v1917_v34  ;;  %v1942_v60 = vand.u32 2147483647, %v1917_v34 }
 0x2c6   :  { %1948 = vst [vmem:[#allocation14] sm:$0xff] %v1931_v52  ;;  %vm1938_vm5 = vweird.f32 %v1917_v34 }
 0x2c7   :  { %v1945_v62 = vor.u32 1.1754944e-38, %v1944_v57  ;;  %vm1943_vm7 = vcmp.eq.f32.partialorder %v1942_v60, 8.507059e+37 }
 0x2cb   :  { %v3148_v54 = vpop.eup %3147 }
 0x2cc   :  { %v1934_v55 = vmul.f32 %v3148_v54, %v1917_v34  ;;  %vm1939_vm4 = vweird.f32 %v3148_v54 }
 0x2cd   :  { %vm1940_vm6 = vmor %vm1938_vm5, %vm1939_vm4 }
 0x2ce   :  { %v1935_v56 = vsub.f32 1.0, %v1934_v55 }
 0x2d0   :  { %v1936_v59 = vmul.f32 %v3148_v54, %v1935_v56 }
 0x2d2   :  { %v1937_v61 = vadd.f32 %v3148_v54, %v1936_v59 }
 0x2d4   :  { %v1941_v63 = vsel %vm1940_vm6, %v3148_v54, %v1937_v61 }
 0x2d5   :  { %v1946_v0 = vsel %vm1943_vm7, %v1945_v62, %v1941_v63 }
 0x2d6   :  { %1949 = vst [vmem:[#allocation14 + $0x8] sm:$0xff] %v1946_v0 }
 0x2d7   :  { %1962 = dma.vmem_to_hbm [thread:$0]  %s1958_s11, 256, %s1960_s29, [#allocation4]  }
 0x2d8   :  { %3397 = dma.done.wait [#allocation4], 256  }
 0x2d9   :  { %3398 = vsyncadd [#allocation4], 4294967040 }
 0x2da   :  { %3399 = dma.done.wait [#allocation16], 256  }
 0x2db   :  { %3400 = vsyncadd [#allocation16], 4294967040 }
 0x2dc   :  { %1997 = vsyncpa [#allocation3], 1 }
 0x2dd   :  { %1998 = vsyncpa [#allocation6], 1 }
 0x2de   :  { %1999 = vsyncpa [#allocation9], 1 }
 0x2df   :  { %2000 = vsyncpa [#allocation12], 1 }
 0x2e0   :  { %2001 = vsyncpa [#allocation4], 1 }
 0x2e1   :  { %2002 = vsyncpa [#allocation16], 1 }

</bundles_post_ra>
